<compile_context>
chip_gen: v7x
topology: tpu7x:2x2x1
jax: 0.10.0
libtpu: 0.0.40
codegen_flags: <defaults>
</compile_context>

<pallas_src>
import functools

import jax
import jax.numpy as jnp
from jax import lax
from jax.experimental import pallas as pl
from jax.experimental.pallas import tpu as pltpu


# ----------------------------- Pallas kernel ------------------------------

def _lightgcn_prop_kernel(r_ref, su_ref, si_ref, ue_ref, ie_ref,   # inputs
                          uo_ref, io_ref,                          # outputs
                          *, n_layers: int):
    """mean([E, A@E, A@(A@E), ...]) using the bipartite block structure.

    A_adj @ [E_u; E_i] = [ D_u^-1/2 R D_i^-1/2 E_i ; D_i^-1/2 R^T D_u^-1/2 E_u ]

    r_ref : (U, I) int8 binary interaction matrix (0/1)
    su_ref: (U, 1) f32 d_u^-1/2        si_ref: (I, 1) f32 d_i^-1/2
    ue_ref: (U, D) f32 user embeddings ie_ref: (I, D) f32 item embeddings
    uo_ref: (U, D) f32 mean user emb.  io_ref: (I, D) f32 mean item emb.
    """
    # 0/1 entries are exact in bf16; single cast, reused across all layers.
    r = r_ref[...].astype(jnp.bfloat16)
    su = su_ref[...]
    si = si_ref[...]

    # Accumulate the layer mean directly in the VMEM-resident output blocks.
    uo_ref[...] = ue_ref[...]
    io_ref[...] = ie_ref[...]

    # Layer 0 operands come straight from the embedding refs (no cur copies).
    scaled_u = (su * ue_ref[...]).astype(jnp.bfloat16)   # d_u^-1/2 * E_u
    scaled_i = (si * ie_ref[...]).astype(jnp.bfloat16)   # d_i^-1/2 * E_i

    # n_layers is a static Python int -> unrolled; two MXU matmuls per layer
    # (bf16 inputs, f32 accumulation) plus VPU degree scalings.
    for layer in range(n_layers):
        new_u = su * jnp.dot(r, scaled_i,
                             preferred_element_type=jnp.float32)
        # R^T @ (d_u^-1/2 * E_u) as a transposed contraction on the same tile.
        new_i = si * lax.dot_general(
            r, scaled_u,
            dimension_numbers=(((0,), (0,)), ((), ())),
            preferred_element_type=jnp.float32)
        uo_ref[...] += new_u
        io_ref[...] += new_i
        if layer + 1 < n_layers:
            scaled_u = (su * new_u).astype(jnp.bfloat16)
            scaled_i = (si * new_i).astype(jnp.bfloat16)

    inv = 1.0 / float(n_layers + 1)
    uo_ref[...] = uo_ref[...] * inv
    io_ref[...] = io_ref[...] * inv


def lightgcn_propagate(r_int8, d_user_inv_sqrt, d_item_inv_sqrt,
                       user_emb, item_emb, n_layers: int):
    """Pallas-call wrapper.

    r_int8: (U, I) int8 binary interaction matrix
    d_user_inv_sqrt: (U,) f32, d_item_inv_sqrt: (I,) f32
    user_emb: (U, D) f32, item_emb: (I, D) f32
    Returns (user_all_embedding (U, D) f32, item_all_embedding (I, D) f32).
    """
    U, I = r_int8.shape
    D = user_emb.shape[1]
    assert user_emb.shape == (U, D) and item_emb.shape == (I, D)

    su = d_user_inv_sqrt.reshape(U, 1).astype(jnp.float32)
    si = d_item_inv_sqrt.reshape(I, 1).astype(jnp.float32)

    # 2 matmuls / layer, 2*U*I*D flops each (VPU scales are negligible).
    flops = 4 * n_layers * U * I * D
    bytes_accessed = (U * I                     # single int8 R block (no R^T)
                      + (U + I) * 4             # degree scale vectors
                      + 2 * (U + I) * D * 4)    # embeddings in + out (f32)

    # Resident VMEM: double-buffered in/out blocks + in-kernel temporaries
    # (bf16 R copy, bf16/f32 layer values).  Clamp to v7x's 64 MiB physical.
    resident = 2 * (U * I + (U + I) * 4 + 2 * (U + I) * D * 4)
    temps = 2 * U * I + 6 * (U + I) * D
    vmem_limit = int(min(64 * 1024 * 1024,
                         max(32 * 1024 * 1024, resident + temps + (8 << 20))))

    kernel = functools.partial(_lightgcn_prop_kernel, n_layers=n_layers)
    user_out, item_out = pl.pallas_call(
        kernel,
        out_shape=(jax.ShapeDtypeStruct((U, D), jnp.float32),
                   jax.ShapeDtypeStruct((I, D), jnp.float32)),
        grid=(1,),
        in_specs=[
            pl.BlockSpec((U, I), lambda i: (0, 0)),
            pl.BlockSpec((U, 1), lambda i: (0, 0)),
            pl.BlockSpec((I, 1), lambda i: (0, 0)),
            pl.BlockSpec((U, D), lambda i: (0, 0)),
            pl.BlockSpec((I, D), lambda i: (0, 0)),
        ],
        out_specs=(
            pl.BlockSpec((U, D), lambda i: (0, 0)),
            pl.BlockSpec((I, D), lambda i: (0, 0)),
        ),
        compiler_params=pltpu.CompilerParams(
            dimension_semantics=("arbitrary",),
            vmem_limit_bytes=vmem_limit),
        cost_estimate=pl.CostEstimate(
            flops=flops, transcendentals=0, bytes_accessed=bytes_accessed),
    )(r_int8, su, si, user_emb, item_emb)
    return user_out, item_out


# ----------------------------- Model (glue) --------------------------------

class LightGCN:
    """JAX/Pallas re-implementation of the PyTorch LightGCN forward()."""

    def __init__(self, user_count, item_count, embedding_size, n_layers,
                 interactions, key):
        self.user_count = user_count
        self.item_count = item_count
        self.embedding_size = embedding_size
        self.n_layers = n_layers

        # nn.Embedding weights with xavier_normal_ init (deterministic).
        ku, ki = jax.random.split(key)
        std_u = (2.0 / (user_count + embedding_size)) ** 0.5
        std_i = (2.0 / (item_count + embedding_size)) ** 0.5
        self.user_embedding = (std_u * jax.random.normal(
            ku, (user_count, embedding_size))).astype(jnp.float32)
        self.item_embedding = (std_i * jax.random.normal(
            ki, (item_count, embedding_size))).astype(jnp.float32)

        # Binary (U, I) interaction block + degree scalings.  Equivalent to
        # the dense A_adj = D^-1/2 A D^-1/2 of the original (A is bipartite,
        # so only the off-diagonal blocks are nonzero):
        #   R_hat = diag(d_u^-1/2) R diag(d_i^-1/2)
        R = (interactions > 0).astype(jnp.float32)
        d_u = R.sum(axis=1) + 1e-7
        d_i = R.sum(axis=0) + 1e-7
        self.r_int8 = R.astype(jnp.int8)
        self.d_user_inv_sqrt = jnp.power(d_u, -0.5).astype(jnp.float32)
        self.d_item_inv_sqrt = jnp.power(d_i, -0.5).astype(jnp.float32)

    def forward(self):
        return lightgcn_propagate(self.r_int8, self.d_user_inv_sqrt,
                                  self.d_item_inv_sqrt,
                                  self.user_embedding, self.item_embedding,
                                  self.n_layers)


# ------------------------------- main --------------------------------------

if __name__ == "__main__":
    key = jax.random.PRNGKey(0)
    k_inter, k_emb = jax.random.split(key)

    user_count = 128
    item_count = 256
    embedding_size = 128
    n_layers = 3

    # Deterministic synthetic interaction matrix (sparse-ish, binary).
    interactions = (jax.random.uniform(
        k_inter, (user_count, item_count)) < 0.1).astype(jnp.float32)

    model = LightGCN(user_count, item_count, embedding_size, n_layers,
                     interactions, k_emb)

    user_e, item_e = model.forward()
    jax.block_until_ready(user_e)
    jax.block_until_ready(item_e)

    # Plain-JAX f32 reference (dense A_adj, same as the torch.sparse.mm loop).
    U, I = user_count, item_count
    N = U + I
    A = jnp.zeros((N, N), dtype=jnp.float32)
    A = A.at[:U, U:].set(interactions)
    A = A.at[U:, :U].set(interactions.T)
    diag = (A > 0).astype(jnp.float32).sum(axis=1) + 1e-7
    d = jnp.power(diag, -0.5)
    a_adj = d[:, None] * A * d[None, :]

    all_e = jnp.concatenate([model.user_embedding, model.item_embedding], 0)
    layers = [all_e]
    cur = all_e
    for _ in range(n_layers):
        cur = a_adj @ cur
        layers.append(cur)
    ref = jnp.mean(jnp.stack(layers, 0), axis=0)

    got = jnp.concatenate([user_e, item_e], 0)
    # bf16 MXU inputs with f32 accumulation -> loosened tolerance vs f32 ref.
    max_err = float(jnp.abs(got - ref).max())
    assert jnp.allclose(got, ref, atol=1e-2, rtol=1e-2), max_err

    assert user_e.shape == (user_count, embedding_size)
    assert item_e.shape == (item_count, embedding_size)
    print("KERNEL_OK")
</pallas_src>

<mosaic_0001>
module attributes {stable_mosaic.version = 11 : i64} {
  func.func @_lightgcn_prop_kernel(%arg0: i32, %arg1: memref<128x256xi8, #tpu.memory_space<vmem>>, %arg2: memref<128x1xf32, #tpu.memory_space<vmem>>, %arg3: memref<256x1xf32, #tpu.memory_space<vmem>>, %arg4: memref<128x128xf32, #tpu.memory_space<vmem>>, %arg5: memref<256x128xf32, #tpu.memory_space<vmem>>, %arg6: memref<128x128xf32, #tpu.memory_space<vmem>>, %arg7: memref<256x128xf32, #tpu.memory_space<vmem>>) attributes {dimension_semantics = [#tpu.dimension_semantics<arbitrary>], iteration_bounds = array<i64: 1>, scalar_prefetch = 0 : i64, scratch_operands = 0 : i64, tpu.core_type = #tpu.core_type<tc>, window_params = [{pipeline_mode = #tpu.pipeline_mode<synchronous>, transform_indices = @transform_0, window_bounds = array<i64: 128, 256>}, {pipeline_mode = #tpu.pipeline_mode<synchronous>, transform_indices = @transform_1, window_bounds = array<i64: 128, 1>}, {pipeline_mode = #tpu.pipeline_mode<synchronous>, transform_indices = @transform_2, window_bounds = array<i64: 256, 1>}, {pipeline_mode = #tpu.pipeline_mode<synchronous>, transform_indices = @transform_3, window_bounds = array<i64: 128, 128>}, {pipeline_mode = #tpu.pipeline_mode<synchronous>, transform_indices = @transform_4, window_bounds = array<i64: 256, 128>}, {pipeline_mode = #tpu.pipeline_mode<synchronous>, transform_indices = @transform_5, window_bounds = array<i64: 128, 128>}, {pipeline_mode = #tpu.pipeline_mode<synchronous>, transform_indices = @transform_6, window_bounds = array<i64: 256, 128>}]} {
    %c0 = arith.constant 0 : index
    %c0_0 = arith.constant 0 : index
    %0 = vector.load %arg1[%c0, %c0_0] : memref<128x256xi8, #tpu.memory_space<vmem>>, vector<128x256xi8>
    %1 = arith.sitofp %0 : vector<128x256xi8> to vector<128x256xbf16>
    %c0_1 = arith.constant 0 : index
    %c0_2 = arith.constant 0 : index
    %2 = vector.load %arg2[%c0_1, %c0_2] : memref<128x1xf32, #tpu.memory_space<vmem>>, vector<128x1xf32>
    %c0_3 = arith.constant 0 : index
    %c0_4 = arith.constant 0 : index
    %3 = vector.load %arg3[%c0_3, %c0_4] : memref<256x1xf32, #tpu.memory_space<vmem>>, vector<256x1xf32>
    %c0_5 = arith.constant 0 : index
    %c0_6 = arith.constant 0 : index
    %4 = vector.load %arg4[%c0_5, %c0_6] : memref<128x128xf32, #tpu.memory_space<vmem>>, vector<128x128xf32>
    %c0_7 = arith.constant 0 : index
    %c0_8 = arith.constant 0 : index
    %5 = vector.load %arg6[%c0_7, %c0_8] : memref<128x128xf32, #tpu.memory_space<vmem>>, vector<128x128xf32>
    tpu.vector_store %arg6[%c0_7, %c0_8], %4 {strides = array<i32>} : memref<128x128xf32, #tpu.memory_space<vmem>>, vector<128x128xf32>,
    %c0_9 = arith.constant 0 : index
    %c0_10 = arith.constant 0 : index
    %6 = vector.load %arg5[%c0_9, %c0_10] : memref<256x128xf32, #tpu.memory_space<vmem>>, vector<256x128xf32>
    %c0_11 = arith.constant 0 : index
    %c0_12 = arith.constant 0 : index
    %7 = vector.load %arg7[%c0_11, %c0_12] : memref<256x128xf32, #tpu.memory_space<vmem>>, vector<256x128xf32>
    tpu.vector_store %arg7[%c0_11, %c0_12], %6 {strides = array<i32>} : memref<256x128xf32, #tpu.memory_space<vmem>>, vector<256x128xf32>,
    %c0_13 = arith.constant 0 : index
    %c0_14 = arith.constant 0 : index
    %8 = vector.load %arg4[%c0_13, %c0_14] : memref<128x128xf32, #tpu.memory_space<vmem>>, vector<128x128xf32>
    %9 = vector.broadcast %2 : vector<128x1xf32> to vector<128x128xf32>
    %10 = arith.mulf %9, %8 : vector<128x128xf32>
    %11 = arith.truncf %10 : vector<128x128xf32> to vector<128x128xbf16>
    %c0_15 = arith.constant 0 : index
    %c0_16 = arith.constant 0 : index
    %12 = vector.load %arg5[%c0_15, %c0_16] : memref<256x128xf32, #tpu.memory_space<vmem>>, vector<256x128xf32>
    %13 = vector.broadcast %3 : vector<256x1xf32> to vector<256x128xf32>
    %14 = arith.mulf %13, %12 : vector<256x128xf32>
    %15 = arith.truncf %14 : vector<256x128xf32> to vector<256x128xbf16>
    %cst = arith.constant dense<0.000000e+00> : vector<128x128xf32>
    %16 = tpu.matmul %1, %15, %cst {dimension_numbers = #tpu.dot_dimension_numbers<[1], [0], [0], [1], [0, 0, 1, 1], [], []>} : vector<128x256xbf16>, vector<256x128xbf16>, vector<128x128xf32> -> vector<128x128xf32>
    %17 = vector.broadcast %2 : vector<128x1xf32> to vector<128x128xf32>
    %18 = arith.mulf %17, %16 : vector<128x128xf32>
    %cst_17 = arith.constant dense<0.000000e+00> : vector<256x128xf32>
    %19 = tpu.matmul %1, %11, %cst_17 {dimension_numbers = #tpu.dot_dimension_numbers<[0], [0], [1], [1], [0, 1, 1, 1], [], []>} : vector<128x256xbf16>, vector<128x128xbf16>, vector<256x128xf32> -> vector<256x128xf32>
    %20 = vector.broadcast %3 : vector<256x1xf32> to vector<256x128xf32>
    %21 = arith.mulf %20, %19 : vector<256x128xf32>
    %c0_18 = arith.constant 0 : index
    %c0_19 = arith.constant 0 : index
    %22 = vector.load %arg6[%c0_18, %c0_19] : memref<128x128xf32, #tpu.memory_space<vmem>>, vector<128x128xf32>
    %23 = arith.addf %22, %18 : vector<128x128xf32>
    %c0_20 = arith.constant 0 : index
    %c0_21 = arith.constant 0 : index
    %24 = vector.load %arg6[%c0_20, %c0_21] : memref<128x128xf32, #tpu.memory_space<vmem>>, vector<128x128xf32>
    tpu.vector_store %arg6[%c0_20, %c0_21], %23 {strides = array<i32>} : memref<128x128xf32, #tpu.memory_space<vmem>>, vector<128x128xf32>,
    %c0_22 = arith.constant 0 : index
    %c0_23 = arith.constant 0 : index
    %25 = vector.load %arg7[%c0_22, %c0_23] : memref<256x128xf32, #tpu.memory_space<vmem>>, vector<256x128xf32>
    %26 = arith.addf %25, %21 : vector<256x128xf32>
    %c0_24 = arith.constant 0 : index
    %c0_25 = arith.constant 0 : index
    %27 = vector.load %arg7[%c0_24, %c0_25] : memref<256x128xf32, #tpu.memory_space<vmem>>, vector<256x128xf32>
    tpu.vector_store %arg7[%c0_24, %c0_25], %26 {strides = array<i32>} : memref<256x128xf32, #tpu.memory_space<vmem>>, vector<256x128xf32>,
    %28 = vector.broadcast %2 : vector<128x1xf32> to vector<128x128xf32>
    %29 = arith.mulf %28, %18 : vector<128x128xf32>
    %30 = arith.truncf %29 : vector<128x128xf32> to vector<128x128xbf16>
    %31 = vector.broadcast %3 : vector<256x1xf32> to vector<256x128xf32>
    %32 = arith.mulf %31, %21 : vector<256x128xf32>
    %33 = arith.truncf %32 : vector<256x128xf32> to vector<256x128xbf16>
    %cst_26 = arith.constant dense<0.000000e+00> : vector<128x128xf32>
    %34 = tpu.matmul %1, %33, %cst_26 {dimension_numbers = #tpu.dot_dimension_numbers<[1], [0], [0], [1], [0, 0, 1, 1], [], []>} : vector<128x256xbf16>, vector<256x128xbf16>, vector<128x128xf32> -> vector<128x128xf32>
    %35 = vector.broadcast %2 : vector<128x1xf32> to vector<128x128xf32>
    %36 = arith.mulf %35, %34 : vector<128x128xf32>
    %cst_27 = arith.constant dense<0.000000e+00> : vector<256x128xf32>
    %37 = tpu.matmul %1, %30, %cst_27 {dimension_numbers = #tpu.dot_dimension_numbers<[0], [0], [1], [1], [0, 1, 1, 1], [], []>} : vector<128x256xbf16>, vector<128x128xbf16>, vector<256x128xf32> -> vector<256x128xf32>
    %38 = vector.broadcast %3 : vector<256x1xf32> to vector<256x128xf32>
    %39 = arith.mulf %38, %37 : vector<256x128xf32>
    %c0_28 = arith.constant 0 : index
    %c0_29 = arith.constant 0 : index
    %40 = vector.load %arg6[%c0_28, %c0_29] : memref<128x128xf32, #tpu.memory_space<vmem>>, vector<128x128xf32>
    %41 = arith.addf %40, %36 : vector<128x128xf32>
    %c0_30 = arith.constant 0 : index
    %c0_31 = arith.constant 0 : index
    %42 = vector.load %arg6[%c0_30, %c0_31] : memref<128x128xf32, #tpu.memory_space<vmem>>, vector<128x128xf32>
    tpu.vector_store %arg6[%c0_30, %c0_31], %41 {strides = array<i32>} : memref<128x128xf32, #tpu.memory_space<vmem>>, vector<128x128xf32>,
    %c0_32 = arith.constant 0 : index
    %c0_33 = arith.constant 0 : index
    %43 = vector.load %arg7[%c0_32, %c0_33] : memref<256x128xf32, #tpu.memory_space<vmem>>, vector<256x128xf32>
    %44 = arith.addf %43, %39 : vector<256x128xf32>
    %c0_34 = arith.constant 0 : index
    %c0_35 = arith.constant 0 : index
    %45 = vector.load %arg7[%c0_34, %c0_35] : memref<256x128xf32, #tpu.memory_space<vmem>>, vector<256x128xf32>
    tpu.vector_store %arg7[%c0_34, %c0_35], %44 {strides = array<i32>} : memref<256x128xf32, #tpu.memory_space<vmem>>, vector<256x128xf32>,
    %46 = vector.broadcast %2 : vector<128x1xf32> to vector<128x128xf32>
    %47 = arith.mulf %46, %36 : vector<128x128xf32>
    %48 = arith.truncf %47 : vector<128x128xf32> to vector<128x128xbf16>
    %49 = vector.broadcast %3 : vector<256x1xf32> to vector<256x128xf32>
    %50 = arith.mulf %49, %39 : vector<256x128xf32>
    %51 = arith.truncf %50 : vector<256x128xf32> to vector<256x128xbf16>
    %cst_36 = arith.constant dense<0.000000e+00> : vector<128x128xf32>
    %52 = tpu.matmul %1, %51, %cst_36 {dimension_numbers = #tpu.dot_dimension_numbers<[1], [0], [0], [1], [0, 0, 1, 1], [], []>} : vector<128x256xbf16>, vector<256x128xbf16>, vector<128x128xf32> -> vector<128x128xf32>
    %53 = vector.broadcast %2 : vector<128x1xf32> to vector<128x128xf32>
    %54 = arith.mulf %53, %52 : vector<128x128xf32>
    %cst_37 = arith.constant dense<0.000000e+00> : vector<256x128xf32>
    %55 = tpu.matmul %1, %48, %cst_37 {dimension_numbers = #tpu.dot_dimension_numbers<[0], [0], [1], [1], [0, 1, 1, 1], [], []>} : vector<128x256xbf16>, vector<128x128xbf16>, vector<256x128xf32> -> vector<256x128xf32>
    %56 = vector.broadcast %3 : vector<256x1xf32> to vector<256x128xf32>
    %57 = arith.mulf %56, %55 : vector<256x128xf32>
    %c0_38 = arith.constant 0 : index
    %c0_39 = arith.constant 0 : index
    %58 = vector.load %arg6[%c0_38, %c0_39] : memref<128x128xf32, #tpu.memory_space<vmem>>, vector<128x128xf32>
    %59 = arith.addf %58, %54 : vector<128x128xf32>
    %c0_40 = arith.constant 0 : index
    %c0_41 = arith.constant 0 : index
    %60 = vector.load %arg6[%c0_40, %c0_41] : memref<128x128xf32, #tpu.memory_space<vmem>>, vector<128x128xf32>
    tpu.vector_store %arg6[%c0_40, %c0_41], %59 {strides = array<i32>} : memref<128x128xf32, #tpu.memory_space<vmem>>, vector<128x128xf32>,
    %c0_42 = arith.constant 0 : index
    %c0_43 = arith.constant 0 : index
    %61 = vector.load %arg7[%c0_42, %c0_43] : memref<256x128xf32, #tpu.memory_space<vmem>>, vector<256x128xf32>
    %62 = arith.addf %61, %57 : vector<256x128xf32>
    %c0_44 = arith.constant 0 : index
    %c0_45 = arith.constant 0 : index
    %63 = vector.load %arg7[%c0_44, %c0_45] : memref<256x128xf32, #tpu.memory_space<vmem>>, vector<256x128xf32>
    tpu.vector_store %arg7[%c0_44, %c0_45], %62 {strides = array<i32>} : memref<256x128xf32, #tpu.memory_space<vmem>>, vector<256x128xf32>,
    %c0_46 = arith.constant 0 : index
    %c0_47 = arith.constant 0 : index
    %64 = vector.load %arg6[%c0_46, %c0_47] : memref<128x128xf32, #tpu.memory_space<vmem>>, vector<128x128xf32>
    %cst_48 = arith.constant 2.500000e-01 : f32
    %65 = vector.broadcast %cst_48 : f32 to vector<128x128xf32>
    %66 = arith.mulf %64, %65 : vector<128x128xf32>
    %c0_49 = arith.constant 0 : index
    %c0_50 = arith.constant 0 : index
    %67 = vector.load %arg6[%c0_49, %c0_50] : memref<128x128xf32, #tpu.memory_space<vmem>>, vector<128x128xf32>
    tpu.vector_store %arg6[%c0_49, %c0_50], %66 {strides = array<i32>} : memref<128x128xf32, #tpu.memory_space<vmem>>, vector<128x128xf32>,
    %c0_51 = arith.constant 0 : index
    %c0_52 = arith.constant 0 : index
    %68 = vector.load %arg7[%c0_51, %c0_52] : memref<256x128xf32, #tpu.memory_space<vmem>>, vector<256x128xf32>
    %cst_53 = arith.constant 2.500000e-01 : f32
    %69 = vector.broadcast %cst_53 : f32 to vector<256x128xf32>
    %70 = arith.mulf %68, %69 : vector<256x128xf32>
    %c0_54 = arith.constant 0 : index
    %c0_55 = arith.constant 0 : index
    %71 = vector.load %arg7[%c0_54, %c0_55] : memref<256x128xf32, #tpu.memory_space<vmem>>, vector<256x128xf32>
    tpu.vector_store %arg7[%c0_54, %c0_55], %70 {strides = array<i32>} : memref<256x128xf32, #tpu.memory_space<vmem>>, vector<256x128xf32>,
    return
  }
  func.func @transform_0(%arg0: i32) -> (i32, i32) {
    %c0_i32 = arith.constant 0 : i32
    %c0_i32_0 = arith.constant 0 : i32
    %c0_i32_1 = arith.constant 0 : i32
    return %c0_i32, %c0_i32_0 : i32, i32
  }
  func.func @transform_1(%arg0: i32) -> (i32, i32) {
    %c0_i32 = arith.constant 0 : i32
    %c0_i32_0 = arith.constant 0 : i32
    %c0_i32_1 = arith.constant 0 : i32
    return %c0_i32, %c0_i32_0 : i32, i32
  }
  func.func @transform_2(%arg0: i32) -> (i32, i32) {
    %c0_i32 = arith.constant 0 : i32
    %c0_i32_0 = arith.constant 0 : i32
    %c0_i32_1 = arith.constant 0 : i32
    return %c0_i32, %c0_i32_0 : i32, i32
  }
  func.func @transform_3(%arg0: i32) -> (i32, i32) {
    %c0_i32 = arith.constant 0 : i32
    %c0_i32_0 = arith.constant 0 : i32
    %c0_i32_1 = arith.constant 0 : i32
    return %c0_i32, %c0_i32_0 : i32, i32
  }
  func.func @transform_4(%arg0: i32) -> (i32, i32) {
    %c0_i32 = arith.constant 0 : i32
    %c0_i32_0 = arith.constant 0 : i32
    %c0_i32_1 = arith.constant 0 : i32
    return %c0_i32, %c0_i32_0 : i32, i32
  }
  func.func @transform_5(%arg0: i32) -> (i32, i32) {
    %c0_i32 = arith.constant 0 : i32
    %c0_i32_0 = arith.constant 0 : i32
    %c0_i32_1 = arith.constant 0 : i32
    return %c0_i32, %c0_i32_0 : i32, i32
  }
  func.func @transform_6(%arg0: i32) -> (i32, i32) {
    %c0_i32 = arith.constant 0 : i32
    %c0_i32_0 = arith.constant 0 : i32
    %c0_i32_1 = arith.constant 0 : i32
    return %c0_i32, %c0_i32_0 : i32, i32
  }
}

</mosaic_0001>

<bundles_post_ra>
// kernel: tpu_custom_call.1
= control target key start
LH: loop header
LB: loop body
LE: loop exit
PB: predicated region body
PF: predicated region fallthrough
CT: control target
= control target key end

     0   :  { %12 = vsyncpa [#allocation3], 0  ;;  %s4344_s0 = inlined_call_operand.hbm [shape: s8[128,256], index: 0, kind: input, shape index: {}]   ;;  %s4345_s1 = inlined_call_operand.vmem [shape: f32[128,1], index: 1, kind: input, shape index: {}]   ;;  %s4346_s2 = inlined_call_operand.vmem [shape: f32[256,1], index: 2, kind: input, shape index: {}]   ;;  %s4347_s3 = inlined_call_operand.vmem [shape: f32[128,128], index: 3, kind: input, shape index: {}]   ;;  %s4348_s4 = inlined_call_operand.vmem [shape: f32[256,128], index: 4, kind: input, shape index: {}]   ;;  %s4349_s5 = inlined_call_operand.hbm [shape: f32[128,128], index: 5, kind: output, shape index: {0}]   ;;  %s4350_s6 = inlined_call_operand.hbm [shape: f32[256,128], index: 6, kind: output, shape index: {1}]  }
   0x1   :  { %13 = vsyncpa [#allocation4], 0 }
   0x2   :  { %14 = vsyncpa [#allocation7], 0  ;;  %s2781_s21 = smov [#allocation2]   ;;  %s2709_s25 = scalar_lea.hbm %s4344_s0, 1024 }
   0x3   :  { %s20_s22 = sshll.u32 %s2781_s21, 4  ;;  %p2710_p0 = scmp.ne.s32.totalorder %s4344_s0, %s2709_s25  ;;  %s21_s22 = int_to_ptr.vmem [resolvable:$true] %s20_s22 }
   0x4   :  { %p2713_p1 = scmp.lt.u32.totalorder %s2709_s25, %s4344_s0 }
   0x6   :  { %p2715_p2 = pnand %p2713_p1, %p2710_p0 }
   0x8   :  { %2718 = shalt.err (!%p2715_p2)
}
   0x9   :  { %s2719_s30 = scalar_lea.vmem %s21_s22, 1024  ;;  %p2724_p4 = scmp.lt.s32.totalorder %s21_s22, %s21_s22 }
   0xa   :  { %p2720_p3 = scmp.ne.s32.totalorder %s21_s22, %s2719_s30  ;;  %p2725_p5 = scmp.lt.s32.totalorder %s2719_s30, %s2719_s30 }
   0xc   :  { %p2726_p6 = por %p2725_p5, %p2724_p4 }
   0xe   :  { %p2727_p7 = pnand %p2726_p6, %p2720_p3 }
  0x10   :  { %2730 = shalt.err (!%p2727_p7)
}
  0x11   :  { %s2782_s7 = smov 256   ;;  %s2783_s8 = smov 16  }
  0x12   :  { %26 = dma.hbm_to_vmem [thread:$0]  %s4344_s0, 1024, %s21_s22, [#allocation3], %s2782_s7, %s2782_s7, %s2783_s8  }
  0x13   :  { %2775 = dma.done.wait [#allocation3], 1024  }
  0x14   :  { %2776 = vsyncadd [#allocation3], 4294966272  ;;  %v2784_v0 = vmov 0   ;;  %v95_v1 = vld [vmem:[%s4346_s2 + $0x80] sm:$0xff]  ;;  %v96_v3 = vld [vmem:[%s4346_s2 + $0x88] sm:$0xff]  ;;  %s2786_s23 = smov [#allocation6]  }
  0x15   :  { %2687 = vset.pattern.permute.xlu1 %v2784_v0  ;;  %2686 = vset.pattern.permute.xlu0 %v2784_v0  ;;  %v79_v2 = vld [vmem:[%s4346_s2] sm:$0xff]  ;;  %v80_v4 = vld [vmem:[%s4346_s2 + $0x8] sm:$0xff]  ;;  %v98_v7 = vld [vmem:[%s4346_s2 + $0x98] sm:$0xff]  ;;  %s2254_s24 = sshll.u32 %s2786_s23, 4  ;;  %s4313_s24 = int_to_ptr.vmem [resolvable:$true] %s2254_s24 }
  0x16   :  { %441 = vperm.xlu0 %2686, %v95_v1   ;;  %361 = vperm.xlu1 %2687, %v79_v2   ;;  %v64_v5 = vld [vmem:[%s4345_s1 + $0x8] sm:$0xff]  ;;  %v63_v6 = vld [vmem:[%s4345_s1] sm:$0xff]  ;;  %v97_v8 = vld [vmem:[%s4346_s2 + $0x90] sm:$0xff] }
  0x17   :  { %v82_v9 = vld [vmem:[%s4346_s2 + $0x18] sm:$0xff]  ;;  %v81_v10 = vld [vmem:[%s4346_s2 + $0x10] sm:$0xff]  ;;  %v100_v13 = vld [vmem:[%s4346_s2 + $0xa8] sm:$0xff] }
  0x18   :  { %v66_v11 = vld [vmem:[%s4345_s1 + $0x18] sm:$0xff]  ;;  %v65_v12 = vld [vmem:[%s4345_s1 + $0x10] sm:$0xff]  ;;  %v99_v14 = vld [vmem:[%s4346_s2 + $0xa0] sm:$0xff] }
  0x19   :  { %v2878_v15 = vld [vmem:[#allocation2 + $0x8] sm:$0xff]  ;;  %v83_v18 = vld [vmem:[%s4346_s2 + $0x20] sm:$0xff]  ;;  %v102_v21 = vld [vmem:[%s4346_s2 + $0xb8] sm:$0xff] }
  0x1a   :  { %446 = vperm.xlu0 %2686, %v96_v3   ;;  %366 = vperm.xlu1 %2687, %v80_v4   ;;  %v2881_v16 = vunpack.c.l.s8.bf16 %v2878_v15  ;;  %v84_v17 = vld [vmem:[%s4346_s2 + $0x28] sm:$0xff]  ;;  %v67_v20 = vld [vmem:[%s4345_s1 + $0x20] sm:$0xff]  ;;  %v101_v22 = vld [vmem:[%s4346_s2 + $0xb0] sm:$0xff]  ;;  %v3000_v58 = vunpack.c.h.s8.bf16 %v2878_v15 }
  0x1b   :  { %v68_v19 = vld [vmem:[%s4345_s1 + $0x28] sm:$0xff]  ;;  %v86_v23 = vld [vmem:[%s4346_s2 + $0x38] sm:$0xff]  ;;  %v85_v24 = vld [vmem:[%s4346_s2 + $0x30] sm:$0xff] }
  0x1c   :  { %4562 = vst [vmem:[#allocation11_spill] sm:$0xff] %v2881_v16  ;;  %599 = vmatprep.mubr.bf16.mxu0 %v2881_v16  ;;  %v70_v25 = vld [vmem:[%s4345_s1 + $0x38] sm:$0xff]  ;;  %v69_v26 = vld [vmem:[%s4345_s1 + $0x30] sm:$0xff]  ;;  %v104_v27 = vld [vmem:[%s4346_s2 + $0xc8] sm:$0xff] }
  0x1d   :  { %v103_v28 = vld [vmem:[%s4346_s2 + $0xc0] sm:$0xff]  ;;  %v88_v29 = vld [vmem:[%s4346_s2 + $0x48] sm:$0xff]  ;;  %v106_v33 = vld [vmem:[%s4346_s2 + $0xd8] sm:$0xff]  ;;  %4568 = vst [vmem:[#allocation17_spill] sm:$0xff] %v3000_v58 }
  0x1e   :  { %230 = vperm.xlu1 %2687, %v64_v5   ;;  %225 = vperm.xlu0 %2686, %v63_v6   ;;  %v87_v30 = vld [vmem:[%s4346_s2 + $0x40] sm:$0xff]  ;;  %v72_v31 = vld [vmem:[%s4345_s1 + $0x48] sm:$0xff]  ;;  %v105_v34 = vld [vmem:[%s4346_s2 + $0xd0] sm:$0xff] }
  0x1f   :  { %v71_v32 = vld [vmem:[%s4345_s1 + $0x40] sm:$0xff]  ;;  %v90_v35 = vld [vmem:[%s4346_s2 + $0x58] sm:$0xff]  ;;  %v89_v36 = vld [vmem:[%s4346_s2 + $0x50] sm:$0xff] }
  0x20   :  { %v74_v37 = vld [vmem:[%s4345_s1 + $0x58] sm:$0xff]  ;;  %v73_v38 = vld [vmem:[%s4345_s1 + $0x50] sm:$0xff]  ;;  %v108_v39 = vld [vmem:[%s4346_s2 + $0xe8] sm:$0xff] }
  0x21   :  { %v107_v40 = vld [vmem:[%s4346_s2 + $0xe0] sm:$0xff]  ;;  %v92_v41 = vld [vmem:[%s4346_s2 + $0x68] sm:$0xff]  ;;  %v110_v45 = vld [vmem:[%s4346_s2 + $0xf8] sm:$0xff] }
  0x22   :  { %456 = vperm.xlu1 %2687, %v98_v7   ;;  %451 = vperm.xlu0 %2686, %v97_v8   ;;  %v91_v42 = vld [vmem:[%s4346_s2 + $0x60] sm:$0xff]  ;;  %v76_v43 = vld [vmem:[%s4345_s1 + $0x68] sm:$0xff]  ;;  %v109_v46 = vld [vmem:[%s4346_s2 + $0xf0] sm:$0xff] }
  0x23   :  { %v75_v44 = vld [vmem:[%s4345_s1 + $0x60] sm:$0xff]  ;;  %v94_v47 = vld [vmem:[%s4346_s2 + $0x78] sm:$0xff]  ;;  %v93_v48 = vld [vmem:[%s4346_s2 + $0x70] sm:$0xff] }
  0x24   :  { %v78_v49 = vld [vmem:[%s4345_s1 + $0x78] sm:$0xff]  ;;  %v77_v50 = vld [vmem:[%s4345_s1 + $0x70] sm:$0xff]  ;;  %v39_v51 = vld [vmem:[#allocation2] sm:$0xff] }
  0x25   :  { %v2986_v52 = vunpack.c.l.s8.bf16 %v39_v51  ;;  %v2989_v53 = vunpack.c.h.s8.bf16 %v39_v51  ;;  %v41_v54 = vld [vmem:[#allocation2 + $0x10] sm:$0xff]  ;;  %v343_v59 = vld [vmem:[%s4348_s4 + $0x80] sm:$0xff]  ;;  %v42_v60 = vld [vmem:[#allocation2 + $0x18] sm:$0xff] }
  0x26   :  { %376 = vperm.xlu1 %2687, %v82_v9   ;;  %371 = vperm.xlu0 %2686, %v81_v10   ;;  %v2992_v55 = vunpack.c.l.s8.bf16 %v41_v54  ;;  %v344_v61 = vld [vmem:[%s4348_s4 + $0x88] sm:$0xff]  ;;  %v327_v62 = vld [vmem:[%s4348_s4] sm:$0xff]  ;;  %v3015_v0 = vunpack.c.h.s8.bf16 %v41_v54  ;;  %v3022_v4 = vunpack.c.l.s8.bf16 %v42_v60 }
  0x27   :  { %4563 = vst [vmem:[#allocation12_spill] sm:$0xff] %v2986_v52  ;;  %4564 = vst [vmem:[#allocation13_spill] sm:$0xff] %v2989_v53  ;;  %v328_v63 = vld [vmem:[%s4348_s4 + $0x8] sm:$0xff]  ;;  %v43_v3 = vld [vmem:[#allocation2 + $0x20] sm:$0xff] }
  0x28   :  { %4565 = vst [vmem:[#allocation14_spill] sm:$0xff] %v2992_v55  ;;  %4569 = vst [vmem:[#allocation18_spill] sm:$0xff] %v3015_v0  ;;  %v3031_v9 = vld [vmem:[%s4347_s3] sm:$0xff]  ;;  %v3036_v10 = vld [vmem:[%s4347_s3 + $0x8] sm:$0xff] }
  0x29   :  { %4572 = vst [vmem:[#allocation21_spill] sm:$0xff] %v3022_v4  ;;  %v348_v51 = vld [vmem:[%s4348_s4 + $0xa8] sm:$0xff] }
  0x2a   :  { %240 = vperm.xlu1 %2687, %v66_v11   ;;  %235 = vperm.xlu0 %2686, %v65_v12  }
  0x2e   :  { %466 = vperm.xlu1 %2687, %v100_v13   ;;  %461 = vperm.xlu0 %2686, %v99_v14   ;;  %v3039_v13 = vunpack.c.l.s8.bf16 %v43_v3 }
  0x30   :  { %4573 = vst [vmem:[#allocation22_spill] sm:$0xff] %v3039_v13 }
  0x32   :  { %386 = vperm.xlu1 %2687, %v84_v17   ;;  %381 = vperm.xlu0 %2686, %v83_v18   ;;  %v3046_v17 = vunpack.c.h.s8.bf16 %v42_v60 }
  0x34   :  { %4576 = vst [vmem:[#allocation25_spill] sm:$0xff] %v3046_v17 }
  0x36   :  { %250 = vperm.xlu1 %2687, %v68_v19   ;;  %245 = vperm.xlu0 %2686, %v67_v20   ;;  %v44_v20 = vld [vmem:[#allocation2 + $0x28] sm:$0xff] }
  0x3a   :  { %476 = vperm.xlu1 %2687, %v102_v21   ;;  %471 = vperm.xlu0 %2686, %v101_v22   ;;  %v345_v21 = vld [vmem:[%s4348_s4 + $0x90] sm:$0xff]  ;;  %v346_v22 = vld [vmem:[%s4348_s4 + $0x98] sm:$0xff] }
  0x3e   :  { %396 = vperm.xlu1 %2687, %v86_v23   ;;  %391 = vperm.xlu0 %2686, %v85_v24   ;;  %v3059_v24 = vunpack.c.h.s8.bf16 %v43_v3  ;;  %v3134_v3 = vld [vmem:[%s4348_s4 + $0x20] sm:$0xff] }
  0x3f   :  { %4593 = vst [vmem:[#allocation42_spill] sm:$0xff] %v3134_v3 }
  0x40   :  { %4577 = vst [vmem:[#allocation26_spill] sm:$0xff] %v3059_v24 }
  0x42   :  { %260 = vperm.xlu1 %2687, %v70_v25   ;;  %255 = vperm.xlu0 %2686, %v69_v26  }
  0x46   :  { %486 = vperm.xlu1 %2687, %v104_v27   ;;  %481 = vperm.xlu0 %2686, %v103_v28   ;;  %v45_v27 = vld [vmem:[#allocation2 + $0x30] sm:$0xff]  ;;  %v3066_v28 = vunpack.c.l.s8.bf16 %v44_v20 }
  0x48   :  { %4580 = vst [vmem:[#allocation29_spill] sm:$0xff] %v3066_v28 }
  0x4a   :  { %406 = vperm.xlu1 %2687, %v88_v29   ;;  %401 = vperm.xlu0 %2686, %v87_v30  }
  0x4e   :  { %270 = vperm.xlu1 %2687, %v72_v31   ;;  %265 = vperm.xlu0 %2686, %v71_v32   ;;  %v3073_v31 = vld [vmem:[%s4348_s4 + $0x10] sm:$0xff]  ;;  %v330_v32 = vld [vmem:[%s4348_s4 + $0x18] sm:$0xff] }
  0x4f   :  { %4581 = vst [vmem:[#allocation30_spill] sm:$0xff] %v3073_v31 }
  0x52   :  { %496 = vperm.xlu1 %2687, %v106_v33   ;;  %491 = vperm.xlu0 %2686, %v105_v34   ;;  %v3079_v34 = vunpack.c.l.s8.bf16 %v45_v27 }
  0x54   :  { %4582 = vst [vmem:[#allocation31_spill] sm:$0xff] %v3079_v34 }
  0x56   :  { %416 = vperm.xlu1 %2687, %v90_v35   ;;  %411 = vperm.xlu0 %2686, %v89_v36  }
  0x5a   :  { %280 = vperm.xlu1 %2687, %v74_v37   ;;  %275 = vperm.xlu0 %2686, %v73_v38   ;;  %v3086_v37 = vunpack.c.h.s8.bf16 %v44_v20 }
  0x5c   :  { %4585 = vst [vmem:[#allocation34_spill] sm:$0xff] %v3086_v37 }
  0x5e   :  { %506 = vperm.xlu1 %2687, %v108_v39   ;;  %501 = vperm.xlu0 %2686, %v107_v40   ;;  %v46_v40 = vld [vmem:[#allocation2 + $0x38] sm:$0xff] }
  0x62   :  { %426 = vperm.xlu1 %2687, %v92_v41   ;;  %421 = vperm.xlu0 %2686, %v91_v42   ;;  %v3094_v41 = vld [vmem:[%s4347_s3 + $0x10] sm:$0xff]  ;;  %v3099_v42 = vld [vmem:[%s4347_s3 + $0x18] sm:$0xff] }
  0x66   :  { %290 = vperm.xlu1 %2687, %v76_v43   ;;  %285 = vperm.xlu0 %2686, %v75_v44   ;;  %v3102_v44 = vunpack.c.h.s8.bf16 %v45_v27 }
  0x68   :  { %4586 = vst [vmem:[#allocation35_spill] sm:$0xff] %v3102_v44 }
  0x6a   :  { %516 = vperm.xlu1 %2687, %v110_v45   ;;  %511 = vperm.xlu0 %2686, %v109_v46  }
  0x6e   :  { %436 = vperm.xlu1 %2687, %v94_v47   ;;  %431 = vperm.xlu0 %2686, %v93_v48   ;;  %v3109_v47 = vunpack.c.l.s8.bf16 %v46_v40 }
  0x70   :  { %4589 = vst [vmem:[#allocation38_spill] sm:$0xff] %v3109_v47 }
  0x72   :  { %300 = vperm.xlu1 %2687, %v78_v49   ;;  %295 = vperm.xlu0 %2686, %v77_v50   ;;  %v347_v50 = vld [vmem:[%s4348_s4 + $0xa0] sm:$0xff] }
  0x90   :  { %680 = vxpose.xlu0.c.b16.start [1/8] %v2986_v52, 128 }
  0x94   :  { %681 = vxpose.xlu0.c.b16.cont [2/8] %v2989_v53, 128 }
  0x95   :  { %v2994_v56 = vpop.permute.xlu0 %441  ;;  %v2996_v57 = vpop.permute.xlu1 %361  ;;  %696 = vxpose.xlu1.c.b16.start [1/8] %v2881_v16, 128 }
  0x96   :  { %4566 = vst [vmem:[#allocation15_spill] sm:$0xff] %v2994_v56  ;;  %4567 = vst [vmem:[#allocation16_spill] sm:$0xff] %v2996_v57  ;;  %v535_v5 = vmul.f32 %v2994_v56, %v343_v59  ;;  %v519_v7 = vmul.f32 %v2996_v57, %v327_v62 }
  0x98   :  { %682 = vxpose.xlu0.c.b16.cont [3/8] %v2992_v55, 128 }
  0x99   :  { %v3017_v1 = vpop.permute.xlu0 %446  ;;  %v3019_v2 = vpop.permute.xlu1 %366  ;;  %697 = vxpose.xlu1.c.b16.cont [2/8] %v3000_v58, 128 }
  0x9a   :  { %4570 = vst [vmem:[#allocation19_spill] sm:$0xff] %v3017_v1  ;;  %4571 = vst [vmem:[#allocation20_spill] sm:$0xff] %v3019_v2  ;;  %v536_v6 = vmul.f32 %v3017_v1, %v344_v61  ;;  %v520_v8 = vmul.f32 %v3019_v2, %v328_v63  ;;  %v3127_v61 = vunpack.c.h.s8.bf16 %v46_v40 }
  0x9c   :  { %683 = vxpose.xlu0.c.b16.cont [4/8] %v3015_v0, 128  ;;  %v559_v11 = vpack.c.bf16 %v536_v6, %v535_v5  ;;  %v551_v12 = vpack.c.bf16 %v520_v8, %v519_v7  ;;  %4592 = vst [vmem:[#allocation41_spill] sm:$0xff] %v3127_v61  ;;  %v3139_v5 = vld [vmem:[%s4348_s4 + $0x28] sm:$0xff] }
  0x9d   :  { %v3041_v14 = vpop.permute.xlu1 %230  ;;  %v3043_v15 = vpop.permute.xlu0 %225  ;;  %698 = vxpose.xlu1.c.b16.cont [3/8] %v3022_v4, 128  ;;  %4594 = vst [vmem:[#allocation43_spill] sm:$0xff] %v3139_v5 }
  0x9e   :  { %4574 = vst [vmem:[#allocation23_spill] sm:$0xff] %v3041_v14  ;;  %4575 = vst [vmem:[#allocation24_spill] sm:$0xff] %v3043_v15  ;;  %2270 = vmatprep.subr.bf16.mxu0 %v559_v11  ;;  %v303_v18 = vmul.f32 %v3043_v15, %v3031_v9  ;;  %v304_v19 = vmul.f32 %v3041_v14, %v3036_v10 }
  0x9f   :  { %2271 = vmatpush3.bf16.msra.mxu0 %v551_v12 }
  0xa0   :  { %684 = vxpose.xlu0.c.b16.cont [5/8] %v3039_v13, 128  ;;  %v319_v23 = vpack.c.bf16 %v304_v19, %v303_v18  ;;  %v3153_v18 = vld [vmem:[%s4347_s3 + $0x20] sm:$0xff]  ;;  %v3158_v19 = vld [vmem:[%s4347_s3 + $0x28] sm:$0xff] }
  0xa1   :  { %v3061_v25 = vpop.permute.xlu1 %456  ;;  %v3063_v26 = vpop.permute.xlu0 %451  ;;  %699 = vxpose.xlu1.c.b16.cont [4/8] %v3046_v17, 128 }
  0xa2   :  { %4578 = vst [vmem:[#allocation27_spill] sm:$0xff] %v3061_v25  ;;  %4579 = vst [vmem:[#allocation28_spill] sm:$0xff] %v3063_v26  ;;  %2534 = vmatprep.subr.bf16.mxu1 %v319_v23  ;;  %v537_v29 = vmul.f32 %v3063_v26, %v345_v21  ;;  %v538_v30 = vmul.f32 %v3061_v25, %v346_v22 }
  0xa3   :  { %2535 = vmatpush3.bf16.msra.mxu1 %v319_v23 }
  0xa4   :  { %685 = vxpose.xlu0.c.b16.cont [6/8] %v3059_v24, 128  ;;  %v560_v33 = vpack.c.bf16 %v538_v30, %v537_v29  ;;  %v349_v29 = vld [vmem:[%s4348_s4 + $0xb0] sm:$0xff]  ;;  %v350_v30 = vld [vmem:[%s4348_s4 + $0xb8] sm:$0xff] }
  0xa5   :  { %v3081_v35 = vpop.permute.xlu1 %376  ;;  %v3083_v36 = vpop.permute.xlu0 %371  ;;  %700 = vxpose.xlu1.c.b16.cont [5/8] %v3066_v28, 128 }
  0xa6   :  { %4583 = vst [vmem:[#allocation32_spill] sm:$0xff] %v3081_v35  ;;  %4584 = vst [vmem:[#allocation33_spill] sm:$0xff] %v3083_v36  ;;  %2272 = vmatprep.subr.bf16.mxu0 %v560_v33  ;;  %v521_v38 = vmul.f32 %v3083_v36, %v3073_v31  ;;  %v522_v39 = vmul.f32 %v3081_v35, %v330_v32 }
  0xa8   :  { %686 = vxpose.xlu0.c.b16.cont [7/8] %v3079_v34, 128  ;;  %v552_v43 = vpack.c.bf16 %v522_v39, %v521_v38 }
  0xa9   :  { %v3104_v45 = vpop.permute.xlu1 %240  ;;  %v3106_v46 = vpop.permute.xlu0 %235  ;;  %701 = vxpose.xlu1.c.b16.cont [6/8] %v3086_v37, 128 }
  0xaa   :  { %4587 = vst [vmem:[#allocation36_spill] sm:$0xff] %v3104_v45  ;;  %4588 = vst [vmem:[#allocation37_spill] sm:$0xff] %v3106_v46  ;;  %2273 = vmatpush3.bf16.msra.mxu0 %v552_v43  ;;  %v305_v48 = vmul.f32 %v3106_v46, %v3094_v41  ;;  %v306_v49 = vmul.f32 %v3104_v45, %v3099_v42  ;;  %v3183_v43 = vld [vmem:[%s4348_s4 + $0x30] sm:$0xff] }
  0xab   :  { %4601 = vst [vmem:[#allocation50_spill] sm:$0xff] %v3183_v43 }
  0xac   :  { %687 = vxpose.xlu0.c.b16.end [8/8] %v3102_v44, 128  ;;  %v320_v54 = vpack.c.bf16 %v306_v49, %v305_v48  ;;  %v3188_v48 = vld [vmem:[%s4348_s4 + $0x38] sm:$0xff] }
  0xad   :  { %v3122_v59 = vpop.permute.xlu1 %466  ;;  %v3124_v60 = vpop.permute.xlu0 %461  ;;  %702 = vxpose.xlu1.c.b16.cont [7/8] %v3109_v47, 128  ;;  %4602 = vst [vmem:[#allocation51_spill] sm:$0xff] %v3188_v48 }
  0xae   :  { %4590 = vst [vmem:[#allocation39_spill] sm:$0xff] %v3122_v59  ;;  %4591 = vst [vmem:[#allocation40_spill] sm:$0xff] %v3124_v60  ;;  %2536 = vmatprep.subr.bf16.mxu1 %v320_v54  ;;  %v539_v62 = vmul.f32 %v3124_v60, %v347_v50  ;;  %v540_v63 = vmul.f32 %v3122_v59, %v348_v51  ;;  %v358_v60 = vld [vmem:[%s4348_s4 + $0xf8] sm:$0xff] }
  0xaf   :  { %2537 = vmatpush3.bf16.msra.mxu1 %v320_v54 }
  0xb0   :  { %v561_v6 = vpack.c.bf16 %v540_v63, %v539_v62  ;;  %v213_v63 = vld [vmem:[%s4347_s3 + $0x30] sm:$0xff] }
  0xb1   :  { %v3141_v7 = vpop.permute.xlu1 %386  ;;  %v3143_v8 = vpop.permute.xlu0 %381  ;;  %703 = vxpose.xlu1.c.b16.end [8/8] %v3127_v61, 128 }
  0xb2   :  { %4595 = vst [vmem:[#allocation44_spill] sm:$0xff] %v3141_v7  ;;  %4596 = vst [vmem:[#allocation45_spill] sm:$0xff] %v3143_v8  ;;  %2274 = vmatprep.subr.bf16.mxu0 %v561_v6  ;;  %v523_v11 = vmul.f32 %v3143_v8, %v3134_v3  ;;  %v524_v12 = vmul.f32 %v3141_v7, %v3139_v5  ;;  %v214_v6 = vld [vmem:[%s4347_s3 + $0x38] sm:$0xff] }
  0xb4   :  { %v553_v20 = vpack.c.bf16 %v524_v12, %v523_v11 }
  0xb5   :  { %v3160_v21 = vpop.permute.xlu1 %250  ;;  %v3162_v22 = vpop.permute.xlu0 %245 }
  0xb6   :  { %4597 = vst [vmem:[#allocation46_spill] sm:$0xff] %v3160_v21  ;;  %4598 = vst [vmem:[#allocation47_spill] sm:$0xff] %v3162_v22  ;;  %2275 = vmatpush3.bf16.msra.mxu0 %v553_v20  ;;  %v307_v23 = vmul.f32 %v3162_v22, %v3153_v18  ;;  %v308_v27 = vmul.f32 %v3160_v21, %v3158_v19 }
  0xb8   :  { %v321_v32 = vpack.c.bf16 %v308_v27, %v307_v23 }
  0xb9   :  { %v3174_v33 = vpop.permute.xlu1 %476  ;;  %v3176_v38 = vpop.permute.xlu0 %471 }
  0xba   :  { %4599 = vst [vmem:[#allocation48_spill] sm:$0xff] %v3174_v33  ;;  %4600 = vst [vmem:[#allocation49_spill] sm:$0xff] %v3176_v38  ;;  %2538 = vmatprep.subr.bf16.mxu1 %v321_v32  ;;  %v541_v39 = vmul.f32 %v3176_v38, %v349_v29  ;;  %v542_v40 = vmul.f32 %v3174_v33, %v350_v30  ;;  %v351_v29 = vld [vmem:[%s4348_s4 + $0xc0] sm:$0xff]  ;;  %v352_v30 = vld [vmem:[%s4348_s4 + $0xc8] sm:$0xff] }
  0xbb   :  { %2539 = vmatpush3.bf16.msra.mxu1 %v321_v32 }
  0xbc   :  { %v562_v49 = vpack.c.bf16 %v542_v40, %v541_v39 }
  0xbd   :  { %v3190_v50 = vpop.permute.xlu1 %396  ;;  %v3192_v51 = vpop.permute.xlu0 %391 }
  0xbe   :  { %4603 = vst [vmem:[#allocation52_spill] sm:$0xff] %v3190_v50  ;;  %4604 = vst [vmem:[#allocation53_spill] sm:$0xff] %v3192_v51  ;;  %2276 = vmatprep.subr.bf16.mxu0 %v562_v49  ;;  %v525_v54 = vmul.f32 %v3192_v51, %v3183_v43  ;;  %v526_v62 = vmul.f32 %v3190_v50, %v3188_v48  ;;  %v354_v48 = vld [vmem:[%s4348_s4 + $0xd8] sm:$0xff] }
  0xc0   :  { %v554_v11 = vpack.c.bf16 %v526_v62, %v525_v54  ;;  %v3225_v62 = vld [vmem:[%s4348_s4 + $0x40] sm:$0xff] }
  0xc1   :  { %v3204_v12 = vpop.permute.xlu1 %260  ;;  %v3206_v20 = vpop.permute.xlu0 %255  ;;  %4609 = vst [vmem:[#allocation58_spill] sm:$0xff] %v3225_v62 }
  0xc2   :  { %4605 = vst [vmem:[#allocation54_spill] sm:$0xff] %v3204_v12  ;;  %4606 = vst [vmem:[#allocation55_spill] sm:$0xff] %v3206_v20  ;;  %2277 = vmatpush3.bf16.msra.mxu0 %v554_v11  ;;  %v309_v23 = vmul.f32 %v3206_v20, %v213_v63  ;;  %v310_v27 = vmul.f32 %v3204_v12, %v214_v6  ;;  %v3230_v63 = vld [vmem:[%s4348_s4 + $0x48] sm:$0xff] }
  0xc3   :  { %4610 = vst [vmem:[#allocation59_spill] sm:$0xff] %v3230_v63 }
  0xc4   :  { %v322_v32 = vpack.c.bf16 %v310_v27, %v309_v23 }
  0xc5   :  { %v3216_v39 = vpop.permute.xlu1 %486  ;;  %v3218_v40 = vpop.permute.xlu0 %481 }
  0xc6   :  { %4607 = vst [vmem:[#allocation56_spill] sm:$0xff] %v3216_v39  ;;  %4608 = vst [vmem:[#allocation57_spill] sm:$0xff] %v3218_v40  ;;  %2540 = vmatprep.subr.bf16.mxu1 %v322_v32  ;;  %v543_v49 = vmul.f32 %v3218_v40, %v351_v29  ;;  %v544_v54 = vmul.f32 %v3216_v39, %v352_v30  ;;  %v215_v30 = vld [vmem:[%s4347_s3 + $0x40] sm:$0xff]  ;;  %v218_v39 = vld [vmem:[%s4347_s3 + $0x58] sm:$0xff] }
  0xc7   :  { %2541 = vmatpush3.bf16.msra.mxu1 %v322_v32  ;;  %v216_v32 = vld [vmem:[%s4347_s3 + $0x48] sm:$0xff] }
  0xc8   :  { %v563_v6 = vpack.c.bf16 %v544_v54, %v543_v49  ;;  %v356_v40 = vld [vmem:[%s4348_s4 + $0xe8] sm:$0xff] }
  0xc9   :  { %v3232_v11 = vpop.permute.xlu1 %406  ;;  %v3234_v23 = vpop.permute.xlu0 %401 }
  0xca   :  { %4611 = vst [vmem:[#allocation60_spill] sm:$0xff] %v3232_v11  ;;  %4612 = vst [vmem:[#allocation61_spill] sm:$0xff] %v3234_v23  ;;  %2278 = vmatprep.subr.bf16.mxu0 %v563_v6  ;;  %v527_v27 = vmul.f32 %v3234_v23, %v3225_v62  ;;  %v528_v29 = vmul.f32 %v3232_v11, %v3230_v63  ;;  %v353_v63 = vld [vmem:[%s4348_s4 + $0xd0] sm:$0xff] }
  0xcc   :  { %v555_v49 = vpack.c.bf16 %v528_v29, %v527_v27 }
  0xcd   :  { %v3246_v54 = vpop.permute.xlu1 %270  ;;  %v3248_v5 = vpop.permute.xlu0 %265 }
  0xce   :  { %4613 = vst [vmem:[#allocation62_spill] sm:$0xff] %v3246_v54  ;;  %4614 = vst [vmem:[#allocation63_spill] sm:$0xff] %v3248_v5  ;;  %2279 = vmatpush3.bf16.msra.mxu0 %v555_v49  ;;  %v311_v6 = vmul.f32 %v3248_v5, %v215_v30  ;;  %v312_v62 = vmul.f32 %v3246_v54, %v216_v32  ;;  %v3267_v32 = vld [vmem:[%s4348_s4 + $0x50] sm:$0xff]  ;;  %v3272_v49 = vld [vmem:[%s4348_s4 + $0x58] sm:$0xff] }
  0xcf   :  { %4617 = vst [vmem:[#allocation66_spill] sm:$0xff] %v3267_v32  ;;  %4618 = vst [vmem:[#allocation67_spill] sm:$0xff] %v3272_v49 }
  0xd0   :  { %v323_v3 = vpack.c.bf16 %v312_v62, %v311_v6 }
  0xd1   :  { %v3258_v43 = vpop.permute.xlu1 %496  ;;  %v3260_v27 = vpop.permute.xlu0 %491 }
  0xd2   :  { %4615 = vst [vmem:[#allocation64_spill] sm:$0xff] %v3258_v43  ;;  %4616 = vst [vmem:[#allocation65_spill] sm:$0xff] %v3260_v27  ;;  %2542 = vmatprep.subr.bf16.mxu1 %v323_v3  ;;  %v545_v29 = vmul.f32 %v3260_v27, %v353_v63  ;;  %v546_v30 = vmul.f32 %v3258_v43, %v354_v48  ;;  %v217_v63 = vld [vmem:[%s4347_s3 + $0x50] sm:$0xff] }
  0xd3   :  { %2543 = vmatpush3.bf16.msra.mxu1 %v323_v3 }
  0xd4   :  { %v564_v62 = vpack.c.bf16 %v546_v30, %v545_v29 }
  0xd5   :  { %v3274_v6 = vpop.permute.xlu1 %416  ;;  %v3276_v31 = vpop.permute.xlu0 %411 }
  0xd6   :  { %4619 = vst [vmem:[#allocation68_spill] sm:$0xff] %v3274_v6  ;;  %4620 = vst [vmem:[#allocation69_spill] sm:$0xff] %v3276_v31  ;;  %2280 = vmatprep.subr.bf16.mxu0 %v564_v62  ;;  %v529_v48 = vmul.f32 %v3276_v31, %v3267_v32  ;;  %v530_v3 = vmul.f32 %v3274_v6, %v3272_v49  ;;  %v355_v49 = vld [vmem:[%s4348_s4 + $0xe0] sm:$0xff] }
  0xd8   :  { %v556_v29 = vpack.c.bf16 %v530_v3, %v529_v48 }
  0xd9   :  { %v3288_v30 = vpop.permute.xlu1 %280  ;;  %v3290_v43 = vpop.permute.xlu0 %275 }
  0xda   :  { %4621 = vst [vmem:[#allocation70_spill] sm:$0xff] %v3288_v30  ;;  %4622 = vst [vmem:[#allocation71_spill] sm:$0xff] %v3290_v43  ;;  %2281 = vmatpush3.bf16.msra.mxu0 %v556_v29  ;;  %v313_v62 = vmul.f32 %v3290_v43, %v217_v63  ;;  %v314_v32 = vmul.f32 %v3288_v30, %v218_v39  ;;  %v3309_v39 = vld [vmem:[%s4348_s4 + $0x60] sm:$0xff]  ;;  %v3314_v29 = vld [vmem:[%s4348_s4 + $0x68] sm:$0xff] }
  0xdb   :  { %4625 = vst [vmem:[#allocation74_spill] sm:$0xff] %v3309_v39  ;;  %4626 = vst [vmem:[#allocation75_spill] sm:$0xff] %v3314_v29 }
  0xdc   :  { %v324_v27 = vpack.c.bf16 %v314_v32, %v313_v62 }
  0xdd   :  { %v3300_v59 = vpop.permute.xlu1 %506  ;;  %v3302_v48 = vpop.permute.xlu0 %501 }
  0xde   :  { %4623 = vst [vmem:[#allocation72_spill] sm:$0xff] %v3300_v59  ;;  %4624 = vst [vmem:[#allocation73_spill] sm:$0xff] %v3302_v48  ;;  %2544 = vmatprep.subr.bf16.mxu1 %v324_v27  ;;  %v547_v3 = vmul.f32 %v3302_v48, %v355_v49  ;;  %v548_v63 = vmul.f32 %v3300_v59, %v356_v40  ;;  %v219_v49 = vld [vmem:[%s4347_s3 + $0x60] sm:$0xff]  ;;  %v220_v59 = vld [vmem:[%s4347_s3 + $0x68] sm:$0xff] }
  0xdf   :  { %2545 = vmatpush3.bf16.msra.mxu1 %v324_v27 }
  0xe0   :  { %v565_v32 = vpack.c.bf16 %v548_v63, %v547_v3 }
  0xe1   :  { %v3316_v62 = vpop.permute.xlu1 %426  ;;  %v3318_v33 = vpop.permute.xlu0 %421 }
  0xe2   :  { %4627 = vst [vmem:[#allocation76_spill] sm:$0xff] %v3316_v62  ;;  %4628 = vst [vmem:[#allocation77_spill] sm:$0xff] %v3318_v33  ;;  %2282 = vmatprep.subr.bf16.mxu0 %v565_v32  ;;  %v531_v40 = vmul.f32 %v3318_v33, %v3309_v39  ;;  %v532_v27 = vmul.f32 %v3316_v62, %v3314_v29  ;;  %v357_v29 = vld [vmem:[%s4348_s4 + $0xf0] sm:$0xff] }
  0xe4   :  { %v557_v3 = vpack.c.bf16 %v532_v27, %v531_v40 }
  0xe5   :  { %v3330_v63 = vpop.permute.xlu1 %290  ;;  %v3332_v48 = vpop.permute.xlu0 %285 }
  0xe6   :  { %4629 = vst [vmem:[#allocation78_spill] sm:$0xff] %v3330_v63  ;;  %4630 = vst [vmem:[#allocation79_spill] sm:$0xff] %v3332_v48  ;;  %2283 = vmatpush3.bf16.msra.mxu0 %v557_v3  ;;  %v315_v32 = vmul.f32 %v3332_v48, %v219_v49  ;;  %v316_v39 = vmul.f32 %v3330_v63, %v220_v59  ;;  %v3351_v59 = vld [vmem:[%s4348_s4 + $0x70] sm:$0xff]  ;;  %v3356_v3 = vld [vmem:[%s4348_s4 + $0x78] sm:$0xff] }
  0xe7   :  { %4633 = vst [vmem:[#allocation82_spill] sm:$0xff] %v3351_v59  ;;  %4634 = vst [vmem:[#allocation83_spill] sm:$0xff] %v3356_v3 }
  0xe8   :  { %v325_v38 = vpack.c.bf16 %v316_v39, %v315_v32 }
  0xe9   :  { %v3342_v30 = vpop.permute.xlu1 %516  ;;  %v3344_v40 = vpop.permute.xlu0 %511 }
  0xea   :  { %4631 = vst [vmem:[#allocation80_spill] sm:$0xff] %v3342_v30  ;;  %4632 = vst [vmem:[#allocation81_spill] sm:$0xff] %v3344_v40  ;;  %2546 = vmatprep.subr.bf16.mxu1 %v325_v38  ;;  %v549_v27 = vmul.f32 %v3344_v40, %v357_v29  ;;  %v550_v49 = vmul.f32 %v3342_v30, %v358_v60  ;;  %v221_v29 = vld [vmem:[%s4347_s3 + $0x70] sm:$0xff]  ;;  %v222_v30 = vld [vmem:[%s4347_s3 + $0x78] sm:$0xff] }
  0xeb   :  { %2547 = vmatpush3.bf16.msra.mxu1 %v325_v38 }
  0xec   :  { %v566_v39 = vpack.c.bf16 %v550_v49, %v549_v27 }
  0xed   :  { %v3358_v32 = vpop.permute.xlu1 %436  ;;  %v3360_v63 = vpop.permute.xlu0 %431 }
  0xee   :  { %4635 = vst [vmem:[#allocation84_spill] sm:$0xff] %v3358_v32  ;;  %4636 = vst [vmem:[#allocation85_spill] sm:$0xff] %v3360_v63  ;;  %2284 = vmatprep.subr.bf16.mxu0 %v566_v39  ;;  %v533_v60 = vmul.f32 %v3360_v63, %v3351_v59  ;;  %v534_v38 = vmul.f32 %v3358_v32, %v3356_v3 }
  0xf0   :  { %v558_v27 = vpack.c.bf16 %v534_v38, %v533_v60 }
  0xf1   :  { %v3372_v49 = vpop.permute.xlu1 %300  ;;  %v3374_v40 = vpop.permute.xlu0 %295 }
  0xf2   :  { %4637 = vst [vmem:[#allocation86_spill] sm:$0xff] %v3372_v49  ;;  %2285 = vmatpush3.bf16.msra.mxu0 %v558_v27  ;;  %v317_v39 = vmul.f32 %v3374_v40, %v221_v29  ;;  %v318_v59 = vmul.f32 %v3372_v49, %v222_v30 }
  0xf4   :  { %v326_v48 = vpack.c.bf16 %v318_v59, %v317_v39 }
  0xf5   :  { %600 = vmatmul.mubr.bf16.vlgmr.msra.gmra.mrb[0].mxu0 %v2986_v52 }
  0xf6   :  { %2548 = vmatprep.subr.bf16.mxu1 %v326_v48  ;;  %v3379_v3 = vpop.trf.xlu0  ;;  %607 = vmatprep.mubr.bf16.mxu0 %v3000_v58 }
  0xf7   :  { %4638 = vst [vmem:[#allocation87_spill] sm:$0xff] %v3379_v3  ;;  %2549 = vmatpush3.bf16.msra.mxu1 %v326_v48  ;;  %2550 = vmatprep.mubr.bf16.mxu1 %v3379_v3 }
  0xfa   :  { %v3383_v60 = vpop.trf.xlu0 }
  0xfb   :  { %4639 = vst [vmem:[#allocation88_spill] sm:$0xff] %v3383_v60  ;;  %2551 = vmatmul.mubr.bf16.vlgmr.msra.gmra.mrb[0].mxu1 %v3383_v60  ;;  %v3395_v48 = vpop.trf.xlu1 }
  0xfc   :  { %4642 = vst [vmem:[#allocation91_spill] sm:$0xff] %v3395_v48 }
  0xfd   :  { %608 = vmatmul.mubr.bf16.gmra.mrb[4].mxu0 %v2989_v53 }
  0xfe   :  { %v3387_v38 = vpop.trf.xlu0  ;;  %615 = vmatprep.mubr.bf16.mxu0 %v3022_v4 }
  0xff   :  { %4640 = vst [vmem:[#allocation89_spill] sm:$0xff] %v3387_v38  ;;  %2554 = vmatprep.mubr.bf16.mxu1 %v3387_v38  ;;  %v3404_v27 = vpop.trf.xlu1 }
 0x100   :  { %4645 = vst [vmem:[#allocation94_spill] sm:$0xff] %v3404_v27 }
 0x102   :  { %v3391_v30 = vpop.trf.xlu0 }
 0x103   :  { %4641 = vst [vmem:[#allocation90_spill] sm:$0xff] %v3391_v30  ;;  %2555 = vmatmul.mubr.bf16.gmra.mrb[4].mxu1 %v3391_v30 }
 0x105   :  { %616 = vmatmul.mubr.bf16.gmra.mrb[8].mxu0 %v2992_v55  ;;  %v3411_v55 = vpop.trf.xlu1 }
 0x106   :  { %v3397_v59 = vpop.trf.xlu0  ;;  %623 = vmatprep.mubr.bf16.mxu0 %v3046_v17  ;;  %4647 = vst [vmem:[#allocation96_spill] sm:$0xff] %v3411_v55 }
 0x107   :  { %4643 = vst [vmem:[#allocation92_spill] sm:$0xff] %v3397_v59  ;;  %2558 = vmatprep.mubr.bf16.mxu1 %v3397_v59 }
 0x109   :  { %v3419_v17 = vpop.trf.xlu1 }
 0x10a   :  { %v3401_v29 = vpop.trf.xlu0  ;;  %4649 = vst [vmem:[#allocation98_spill] sm:$0xff] %v3419_v17 }
 0x10b   :  { %4644 = vst [vmem:[#allocation93_spill] sm:$0xff] %v3401_v29  ;;  %2559 = vmatmul.mubr.bf16.gmra.mrb[8].mxu1 %v3401_v29 }
 0x10d   :  { %624 = vmatmul.mubr.bf16.gmra.mrb[12].mxu0 %v3015_v0 }
 0x10e   :  { %v3407_v39 = vpop.trf.xlu0  ;;  %631 = vmatprep.mubr.bf16.mxu0 %v3066_v28  ;;  %v3424_v28 = vpop.trf.xlu1 }
 0x10f   :  { %4646 = vst [vmem:[#allocation95_spill] sm:$0xff] %v3407_v39  ;;  %2562 = vmatprep.mubr.bf16.mxu1 %v3407_v39  ;;  %4650 = vst [vmem:[#allocation99_spill] sm:$0xff] %v3424_v28 }
 0x112   :  { %v3413_v4 = vpop.trf.xlu0  ;;  %v3428_v0 = vpop.trf.xlu1 }
 0x113   :  { %4648 = vst [vmem:[#allocation97_spill] sm:$0xff] %v3413_v4  ;;  %2563 = vmatmul.mubr.bf16.gmra.mrb[12].mxu1 %v3413_v4  ;;  %4651 = vst [vmem:[#allocation100_spill] sm:$0xff] %v3428_v0 }
 0x114   :  { %2566 = vmatprep.mubr.bf16.mxu1 %v3395_v48 }
 0x115   :  { %632 = vmatmul.mubr.bf16.gmra.mrb[16].mxu0 %v3039_v13 }
 0x116   :  { %639 = vmatprep.mubr.bf16.mxu0 %v3086_v37  ;;  %v3433_v37 = vpop.trf.xlu1 }
 0x117   :  { %4652 = vst [vmem:[#allocation101_spill] sm:$0xff] %v3433_v37 }
 0x11b   :  { %2567 = vmatmul.mubr.bf16.gmra.mrb[16].mxu1 %v3404_v27 }
 0x11c   :  { %2570 = vmatprep.mubr.bf16.mxu1 %v3411_v55 }
 0x11d   :  { %640 = vmatmul.mubr.bf16.gmra.mrb[20].mxu0 %v3059_v24 }
 0x11e   :  { %647 = vmatprep.mubr.bf16.mxu0 %v3109_v47  ;;  %v3439_v47 = vpop.trf.xlu1 }
 0x11f   :  { %4653 = vst [vmem:[#allocation102_spill] sm:$0xff] %v3439_v47 }
 0x123   :  { %2571 = vmatmul.mubr.bf16.gmra.mrb[20].mxu1 %v3419_v17 }
 0x124   :  { %2574 = vmatprep.mubr.bf16.mxu1 %v3424_v28 }
 0x125   :  { %648 = vmatmul.mubr.bf16.gmra.mrb[24].mxu0 %v3079_v34 }
 0x126   :  { %655 = vmatprep.mubr.bf16.mxu0 %v3127_v61 }
 0x12b   :  { %2575 = vmatmul.mubr.bf16.gmra.mrb[24].mxu1 %v3428_v0 }
 0x12c   :  { %2578 = vmatprep.mubr.bf16.mxu1 %v3433_v37 }
 0x12d   :  { %656 = vmatmul.mubr.bf16.gmra.mrb[28].mxu0 %v3102_v44 }
 0x12e   :  { %1153 = vmatprep.mubr.bf16.mxu0 %v2881_v16 }
 0x133   :  { %2579 = vmatmul.mubr.bf16.gmra.mrb[28].mxu1 %v3439_v47 }
 0x134   :  { %2598 = vmatprep.mubr.bf16.mxu1 %v3379_v3 }
 0x1c8   :  { %v2286_v24 = vpop.f32.mrb[0].mxu0 }
 0x1c9   :  { %v2287_v34 = vpop.f32.mrb[1].mxu0 }
 0x1ca   :  { %v2288_v28 = vadd.f32 %v2287_v34, %v2286_v24  ;;  %v2289_v61 = vpop.f32.mrb[2].mxu0 }
 0x1cb   :  { %v2290_v17 = vpop.f32.mrb[3].mxu0 }
 0x1cc   :  { %v664_v13 = vmul.f32 %v2288_v28, %v3043_v15  ;;  %v2291_v0 = vadd.f32 %v2290_v17, %v2289_v61 }
 0x1ce   :  { %v921_v37 = vadd.f32 %v664_v13, %v3031_v9  ;;  %v665_v44 = vmul.f32 %v2291_v0, %v3041_v14  ;;  %v2552_v55 = vpop.f32.mrb[0].mxu1  ;;  %v1049_v17 = vmul.f32 %v664_v13, %v3043_v15 }
 0x1cf   :  { %v3447_v16 = vmul.f32 %v2552_v55, %v3083_v36  ;;  %v746_v27 = vpop.f32.mrb[1].mxu1 }
 0x1d0   :  { %937 = vst [vmem:[#allocation5] sm:$0xff] %v921_v37  ;;  %v922_v3 = vadd.f32 %v665_v44, %v3036_v10  ;;  %v1050_v47 = vmul.f32 %v665_v44, %v3041_v14  ;;  %v3452_v24 = vmul.f32 %v746_v27, %v2996_v57  ;;  %v2292_v34 = vpop.f32.mrb[4].mxu0  ;;  %v2553_v28 = vpop.f32.mrb[2].mxu1 }
 0x1d1   :  { %v3456_v9 = vmul.f32 %v2553_v28, %v3081_v35  ;;  %v2293_v0 = vpop.f32.mrb[5].mxu0  ;;  %v749_v61 = vpop.f32.mrb[3].mxu1  ;;  %v3463_v44 = vmul.f32 %v3447_v16, %v3083_v36 }
 0x1d2   :  { %938 = vst [vmem:[#allocation5 + $0x8] sm:$0xff] %v922_v3  ;;  %v2294_v55 = vadd.f32 %v2293_v0, %v2292_v34  ;;  %v3459_v37 = vmul.f32 %v749_v61, %v3019_v2  ;;  %v2295_v10 = vpop.f32.mrb[6].mxu0  ;;  %v1065_v14 = vpack.c.bf16 %v1050_v47, %v1049_v17  ;;  %v3471_v28 = vmul.f32 %v3452_v24, %v2996_v57 }
 0x1d3   :  { %4654 = vst [vmem:[#allocation103_spill] sm:$0xff] %v3456_v9  ;;  %v3467_v27 = vmul.f32 %v3456_v9, %v3081_v35  ;;  %v2296_v13 = vpop.f32.mrb[7].mxu0 }
 0x1d4   :  { %4655 = vst [vmem:[#allocation104_spill] sm:$0xff] %v3459_v37  ;;  %v666_v3 = vmul.f32 %v2294_v55, %v3106_v46  ;;  %v3476_v34 = vmul.f32 %v3459_v37, %v3019_v2  ;;  %v2297_v0 = vadd.f32 %v2296_v13, %v2295_v10  ;;  %2582 = vmatprep.subr.bf16.mxu1 %v1065_v14 }
 0x1d5   :  { %2583 = vmatpush3.bf16.msra.mxu1 %v1065_v14 }
 0x1d6   :  { %v923_v15 = vadd.f32 %v666_v3, %v3094_v41  ;;  %v667_v17 = vmul.f32 %v2297_v0, %v3104_v45  ;;  %v2556_v35 = vpop.f32.mrb[4].mxu1  ;;  %v1051_v47 = vmul.f32 %v666_v3, %v3106_v46 }
 0x1d7   :  { %v3485_v55 = vmul.f32 %v2556_v35, %v3192_v51  ;;  %v762_v9 = vpop.f32.mrb[5].mxu1 }
 0x1d8   :  { %939 = vst [vmem:[#allocation5 + $0x10] sm:$0xff] %v923_v15  ;;  %v924_v10 = vadd.f32 %v667_v17, %v3099_v42  ;;  %v1052_v13 = vmul.f32 %v667_v17, %v3104_v45  ;;  %v3490_v61 = vmul.f32 %v762_v9, %v3143_v8  ;;  %v2298_v41 = vpop.f32.mrb[8].mxu0  ;;  %v2557_v2 = vpop.f32.mrb[6].mxu1 }
 0x1d9   :  { %v3494_v0 = vmul.f32 %v2557_v2, %v3190_v50  ;;  %v2299_v14 = vpop.f32.mrb[9].mxu0  ;;  %v765_v37 = vpop.f32.mrb[7].mxu1  ;;  %v3501_v17 = vmul.f32 %v3485_v55, %v3192_v51 }
 0x1da   :  { %940 = vst [vmem:[#allocation5 + $0x18] sm:$0xff] %v924_v10  ;;  %v2300_v35 = vadd.f32 %v2299_v14, %v2298_v41  ;;  %v3497_v15 = vmul.f32 %v765_v37, %v3141_v7  ;;  %v2301_v42 = vpop.f32.mrb[10].mxu0  ;;  %v1066_v45 = vpack.c.bf16 %v1052_v13, %v1051_v47  ;;  %v3509_v2 = vmul.f32 %v3490_v61, %v3143_v8 }
 0x1db   :  { %4656 = vst [vmem:[#allocation105_spill] sm:$0xff] %v3494_v0  ;;  %v3505_v9 = vmul.f32 %v3494_v0, %v3190_v50  ;;  %v2302_v3 = vpop.f32.mrb[11].mxu0 }
 0x1dc   :  { %4657 = vst [vmem:[#allocation106_spill] sm:$0xff] %v3497_v15  ;;  %v668_v10 = vmul.f32 %v2300_v35, %v3162_v22  ;;  %v3514_v37 = vmul.f32 %v3497_v15, %v3141_v7  ;;  %v2303_v41 = vadd.f32 %v2302_v3, %v2301_v42  ;;  %2584 = vmatprep.subr.bf16.mxu1 %v1066_v45 }
 0x1dd   :  { %2585 = vmatpush3.bf16.msra.mxu1 %v1066_v45 }
 0x1de   :  { %v925_v46 = vadd.f32 %v668_v10, %v3153_v18  ;;  %v669_v13 = vmul.f32 %v2303_v41, %v3160_v21  ;;  %v2560_v50 = vpop.f32.mrb[8].mxu1  ;;  %v1053_v47 = vmul.f32 %v668_v10, %v3162_v22 }
 0x1df   :  { %v3523_v35 = vmul.f32 %v2560_v50, %v3276_v31  ;;  %v778_v0 = vpop.f32.mrb[9].mxu1 }
 0x1e0   :  { %941 = vst [vmem:[#allocation5 + $0x20] sm:$0xff] %v925_v46  ;;  %v926_v42 = vadd.f32 %v669_v13, %v3158_v19  ;;  %v1054_v3 = vmul.f32 %v669_v13, %v3160_v21  ;;  %v3528_v14 = vmul.f32 %v778_v0, %v3234_v23  ;;  %v2304_v18 = vpop.f32.mrb[12].mxu0  ;;  %v2561_v7 = vpop.f32.mrb[10].mxu1 }
 0x1e1   :  { %v3532_v41 = vmul.f32 %v2561_v7, %v3274_v6  ;;  %v2305_v45 = vpop.f32.mrb[13].mxu0  ;;  %v781_v15 = vpop.f32.mrb[11].mxu1  ;;  %v3539_v13 = vmul.f32 %v3523_v35, %v3276_v31 }
 0x1e2   :  { %942 = vst [vmem:[#allocation5 + $0x28] sm:$0xff] %v926_v42  ;;  %v2306_v50 = vadd.f32 %v2305_v45, %v2304_v18  ;;  %v3535_v46 = vmul.f32 %v781_v15, %v3232_v11  ;;  %v2307_v19 = vpop.f32.mrb[14].mxu0  ;;  %v1067_v21 = vpack.c.bf16 %v1054_v3, %v1053_v47  ;;  %v3547_v7 = vmul.f32 %v3528_v14, %v3234_v23 }
 0x1e3   :  { %4658 = vst [vmem:[#allocation107_spill] sm:$0xff] %v3532_v41  ;;  %v3543_v0 = vmul.f32 %v3532_v41, %v3274_v6  ;;  %v2308_v10 = vpop.f32.mrb[15].mxu0 }
 0x1e4   :  { %4659 = vst [vmem:[#allocation108_spill] sm:$0xff] %v3535_v46  ;;  %v3551_v42 = vmul.f32 %v3535_v46, %v3232_v11  ;;  %v2309_v15 = vadd.f32 %v2308_v10, %v2307_v19  ;;  %v3556_v45 = vmul.f32 %v2306_v50, %v3206_v20  ;;  %2586 = vmatprep.subr.bf16.mxu1 %v1067_v21 }
 0x1e5   :  { %2587 = vmatpush3.bf16.msra.mxu1 %v1067_v21 }
 0x1e6   :  { %4660 = vst [vmem:[#allocation109_spill] sm:$0xff] %v3556_v45  ;;  %v3561_v47 = vmul.f32 %v2309_v15, %v3204_v12  ;;  %v2564_v3 = vpop.f32.mrb[12].mxu1  ;;  %v1055_v22 = vmul.f32 %v3556_v45, %v3206_v20 }
 0x1e7   :  { %v3564_v6 = vmul.f32 %v2564_v3, %v3360_v63  ;;  %v794_v11 = vpop.f32.mrb[13].mxu1 }
 0x1e8   :  { %4661 = vst [vmem:[#allocation110_spill] sm:$0xff] %v3561_v47  ;;  %v1056_v19 = vmul.f32 %v3561_v47, %v3204_v12  ;;  %v3569_v10 = vmul.f32 %v794_v11, %v3318_v33  ;;  %v2310_v50 = vpop.f32.mrb[16].mxu0  ;;  %v2565_v18 = vpop.f32.mrb[14].mxu1 }
 0x1e9   :  { %4662 = vst [vmem:[#allocation111_spill] sm:$0xff] %v3564_v6  ;;  %v3574_v15 = vmul.f32 %v2565_v18, %v3358_v32  ;;  %v2311_v21 = vpop.f32.mrb[17].mxu0  ;;  %v797_v46 = vpop.f32.mrb[15].mxu1  ;;  %v3581_v12 = vmul.f32 %v3564_v6, %v3360_v63 }
 0x1ea   :  { %4663 = vst [vmem:[#allocation112_spill] sm:$0xff] %v3569_v10  ;;  %v2312_v41 = vadd.f32 %v2311_v21, %v2310_v50  ;;  %v3577_v3 = vmul.f32 %v797_v46, %v3316_v62  ;;  %v2313_v23 = vpop.f32.mrb[18].mxu0  ;;  %v1068_v20 = vpack.c.bf16 %v1056_v19, %v1055_v22  ;;  %v3589_v18 = vmul.f32 %v3569_v10, %v3318_v33 }
 0x1eb   :  { %4664 = vst [vmem:[#allocation113_spill] sm:$0xff] %v3574_v15  ;;  %v3585_v11 = vmul.f32 %v3574_v15, %v3358_v32  ;;  %v2314_v47 = vpop.f32.mrb[19].mxu0 }
 0x1ec   :  { %4665 = vst [vmem:[#allocation114_spill] sm:$0xff] %v3577_v3  ;;  %v3593_v50 = vmul.f32 %v3577_v3, %v3316_v62  ;;  %v2315_v46 = vadd.f32 %v2314_v47, %v2313_v23  ;;  %v3598_v45 = vmul.f32 %v2312_v41, %v3248_v5  ;;  %2588 = vmatprep.subr.bf16.mxu1 %v1068_v20 }
 0x1ed   :  { %2589 = vmatpush3.bf16.msra.mxu1 %v1068_v20 }
 0x1ee   :  { %4666 = vst [vmem:[#allocation115_spill] sm:$0xff] %v3598_v45  ;;  %v3603_v22 = vmul.f32 %v2315_v46, %v3246_v54  ;;  %v2568_v19 = vpop.f32.mrb[16].mxu1  ;;  %v1057_v32 = vmul.f32 %v3598_v45, %v3248_v5 }
 0x1ef   :  { %v3606_v15 = vmul.f32 %v2568_v19, %v3063_v26  ;;  %v810_v62 = vpop.f32.mrb[17].mxu1 }
 0x1f0   :  { %4667 = vst [vmem:[#allocation116_spill] sm:$0xff] %v3603_v22  ;;  %v1058_v23 = vmul.f32 %v3603_v22, %v3246_v54  ;;  %v3611_v47 = vmul.f32 %v810_v62, %v2994_v56  ;;  %v2316_v41 = vpop.f32.mrb[20].mxu0  ;;  %v2569_v21 = vpop.f32.mrb[18].mxu1 }
 0x1f1   :  { %v3616_v46 = vmul.f32 %v2569_v21, %v3061_v25  ;;  %v2317_v20 = vpop.f32.mrb[21].mxu0  ;;  %v813_v3 = vpop.f32.mrb[19].mxu1  ;;  %v1091_v54 = vmul.f32 %v3606_v15, %v3063_v26 }
 0x1f2   :  { %v2318_v33 = vadd.f32 %v2317_v20, %v2316_v41  ;;  %v3619_v19 = vmul.f32 %v813_v3, %v3017_v1  ;;  %v2319_v10 = vpop.f32.mrb[22].mxu0  ;;  %v1069_v63 = vpack.c.bf16 %v1058_v23, %v1057_v32  ;;  %v1089_v5 = vmul.f32 %v3611_v47, %v2994_v56  ;;  %v4671_v20 = vld [vmem:[#allocation70_spill] sm:$0xff] }
 0x1f3   :  { %4668 = vst [vmem:[#allocation117_spill] sm:$0xff] %v3616_v46  ;;  %v1092_v62 = vmul.f32 %v3616_v46, %v3061_v25  ;;  %v2320_v22 = vpop.f32.mrb[23].mxu0  ;;  %v4673_v46 = vld [vmem:[#allocation49_spill] sm:$0xff] }
 0x1f4   :  { %4669 = vst [vmem:[#allocation118_spill] sm:$0xff] %v3619_v19  ;;  %v1090_v21 = vmul.f32 %v3619_v19, %v3017_v1  ;;  %v2321_v45 = vadd.f32 %v2320_v22, %v2319_v10  ;;  %v3630_v41 = vmul.f32 %v2318_v33, %v3290_v43  ;;  %2590 = vmatprep.subr.bf16.mxu1 %v1069_v63  ;;  %v4674_v1 = vld [vmem:[#allocation40_spill] sm:$0xff] }
 0x1f5   :  { %v1114_v3 = vpack.c.bf16 %v1092_v62, %v1091_v54  ;;  %2591 = vmatpush3.bf16.msra.mxu1 %v1069_v63 }
 0x1f6   :  { %4670 = vst [vmem:[#allocation119_spill] sm:$0xff] %v3630_v41  ;;  %v3633_v6 = vmul.f32 %v2321_v45, %v4671_v20  ;;  %v2572_v26 = vpop.f32.mrb[20].mxu1  ;;  %v1113_v25 = vpack.c.bf16 %v1090_v21, %v1089_v5  ;;  %v1059_v54 = vmul.f32 %v3630_v41, %v3290_v43  ;;  %v4675_v45 = vld [vmem:[#allocation48_spill] sm:$0xff] }
 0x1f7   :  { %v3636_v32 = vmul.f32 %v2572_v26, %v4673_v46  ;;  %v826_v23 = vpop.f32.mrb[21].mxu1  ;;  %v4677_v26 = vpack.c.bf16 %v3476_v34, %v3471_v28 }
 0x1f8   :  { %4672 = vst [vmem:[#allocation120_spill] sm:$0xff] %v3633_v6  ;;  %v1060_v56 = vmul.f32 %v3633_v6, %v4671_v20  ;;  %v3641_v10 = vmul.f32 %v826_v23, %v4674_v1  ;;  %v2322_v33 = vpop.f32.mrb[24].mxu0  ;;  %v2573_v22 = vpop.f32.mrb[22].mxu1  ;;  %2358 = vmatprep.subr.bf16.mxu0 %v1113_v25  ;;  %v4678_v20 = vld [vmem:[#allocation39_spill] sm:$0xff] }
 0x1f9   :  { %v3646_v63 = vmul.f32 %v2573_v22, %v4675_v45  ;;  %v2323_v5 = vpop.f32.mrb[25].mxu0  ;;  %v829_v62 = vpop.f32.mrb[23].mxu1  ;;  %2359 = vmatpush3.bf16.msra.mxu0 %v4677_v26  ;;  %v1095_v25 = vmul.f32 %v3636_v32, %v4673_v46  ;;  %v4683_v26 = vld [vmem:[#allocation78_spill] sm:$0xff] }
 0x1fa   :  { %v2324_v21 = vadd.f32 %v2323_v5, %v2322_v33  ;;  %v3652_v6 = vmul.f32 %v829_v62, %v4678_v20  ;;  %v2325_v23 = vpop.f32.mrb[26].mxu0  ;;  %2360 = vmatprep.subr.bf16.mxu0 %v1114_v3  ;;  %v1070_v41 = vpack.c.bf16 %v1060_v56, %v1059_v54  ;;  %v1093_v19 = vmul.f32 %v3641_v10, %v4674_v1  ;;  %v4680_v33 = vld [vmem:[#allocation79_spill] sm:$0xff] }
 0x1fb   :  { %4676 = vst [vmem:[#allocation49_spill] sm:$0xff] %v3646_v63  ;;  %v1096_v43 = vmul.f32 %v3646_v63, %v4675_v45  ;;  %v2326_v22 = vpop.f32.mrb[27].mxu0  ;;  %v4682_v3 = vpack.c.bf16 %v3467_v27, %v3463_v44  ;;  %v4685_v63 = vld [vmem:[#allocation65_spill] sm:$0xff]  ;;  %v4687_v27 = vld [vmem:[#allocation64_spill] sm:$0xff] }
 0x1fc   :  { %4679 = vst [vmem:[#allocation121_spill] sm:$0xff] %v3652_v6  ;;  %v1094_v28 = vmul.f32 %v3652_v6, %v4678_v20  ;;  %v2327_v34 = vadd.f32 %v2326_v22, %v2325_v23  ;;  %v3663_v5 = vmul.f32 %v2324_v21, %v4680_v33  ;;  %2592 = vmatprep.subr.bf16.mxu1 %v1070_v41  ;;  %v4686_v23 = vld [vmem:[#allocation57_spill] sm:$0xff] }
 0x1fd   :  { %2361 = vmatpush3.bf16.msra.mxu0 %v4682_v3  ;;  %v1116_v62 = vpack.c.bf16 %v1096_v43, %v1095_v25  ;;  %2593 = vmatpush3.bf16.msra.mxu1 %v1070_v41  ;;  %v4689_v3 = vld [vmem:[#allocation56_spill] sm:$0xff] }
 0x1fe   :  { %4681 = vst [vmem:[#allocation122_spill] sm:$0xff] %v3663_v5  ;;  %v3669_v45 = vmul.f32 %v2327_v34, %v4683_v26  ;;  %v2576_v56 = vpop.f32.mrb[24].mxu1  ;;  %v1115_v54 = vpack.c.bf16 %v1094_v28, %v1093_v19  ;;  %v1061_v43 = vmul.f32 %v3663_v5, %v4680_v33  ;;  %v4688_v28 = vpack.c.bf16 %v3514_v37, %v3509_v2 }
 0x1ff   :  { %v3672_v1 = vmul.f32 %v2576_v56, %v4685_v63  ;;  %v842_v20 = vpop.f32.mrb[25].mxu1 }
 0x200   :  { %4684 = vst [vmem:[#allocation123_spill] sm:$0xff] %v3669_v45  ;;  %v1062_v21 = vmul.f32 %v3669_v45, %v4683_v26  ;;  %v3677_v22 = vmul.f32 %v842_v20, %v4686_v23  ;;  %v2328_v6 = vpop.f32.mrb[28].mxu0  ;;  %v2577_v44 = vpop.f32.mrb[26].mxu1  ;;  %2362 = vmatprep.subr.bf16.mxu0 %v1115_v54 }
 0x201   :  { %v3682_v41 = vmul.f32 %v2577_v44, %v4687_v27  ;;  %v2329_v19 = vpop.f32.mrb[29].mxu0  ;;  %v845_v25 = vpop.f32.mrb[27].mxu1  ;;  %2363 = vmatpush3.bf16.msra.mxu0 %v4688_v28  ;;  %v1099_v54 = vmul.f32 %v3672_v1, %v4685_v63  ;;  %v4691_v28 = vld [vmem:[#allocation81_spill] sm:$0xff] }
 0x202   :  { %v2330_v34 = vadd.f32 %v2329_v19, %v2328_v6  ;;  %v3688_v56 = vmul.f32 %v845_v25, %v4689_v3  ;;  %v2331_v20 = vpop.f32.mrb[30].mxu0  ;;  %2364 = vmatprep.subr.bf16.mxu0 %v1116_v62  ;;  %v1071_v45 = vpack.c.bf16 %v1062_v21, %v1061_v43  ;;  %v1097_v33 = vmul.f32 %v3677_v22, %v4686_v23 }
 0x203   :  { %v1100_v26 = vmul.f32 %v3682_v41, %v4687_v27  ;;  %v2332_v44 = vpop.f32.mrb[31].mxu0  ;;  %v4690_v62 = vpack.c.bf16 %v3505_v9, %v3501_v17 }
 0x204   :  { %v3697_v2 = vmul.f32 %v2330_v34, %v3374_v40  ;;  %v1098_v6 = vmul.f32 %v3688_v56, %v4689_v3  ;;  %v2333_v37 = vadd.f32 %v2332_v44, %v2331_v20  ;;  %2594 = vmatprep.subr.bf16.mxu1 %v1071_v45  ;;  %v4692_v44 = vld [vmem:[#allocation73_spill] sm:$0xff] }
 0x205   :  { %2365 = vmatpush3.bf16.msra.mxu0 %v4690_v62  ;;  %v1118_v19 = vpack.c.bf16 %v1100_v26, %v1099_v54  ;;  %2595 = vmatpush3.bf16.msra.mxu1 %v1071_v45  ;;  %v4693_v26 = vld [vmem:[#allocation80_spill] sm:$0xff] }
 0x206   :  { %v3705_v25 = vmul.f32 %v2333_v37, %v3372_v49  ;;  %v2580_v21 = vpop.f32.mrb[28].mxu1  ;;  %v1117_v43 = vpack.c.bf16 %v1098_v6, %v1097_v33  ;;  %v1063_v3 = vmul.f32 %v3697_v2, %v3374_v40  ;;  %v4694_v33 = vpack.c.bf16 %v3551_v42, %v3547_v7  ;;  %v4695_v6 = vld [vmem:[#allocation72_spill] sm:$0xff] }
 0x207   :  { %v3708_v5 = vmul.f32 %v2580_v21, %v4691_v28  ;;  %v858_v34 = vpop.f32.mrb[29].mxu1  ;;  %v4696_v7 = vpack.c.bf16 %v3543_v0, %v3539_v13  ;;  %v4699_v13 = vld [vmem:[#allocation21_spill] sm:$0xff]  ;;  %v4700_v0 = vld [vmem:[#allocation14_spill] sm:$0xff] }
 0x208   :  { %v1064_v20 = vmul.f32 %v3705_v25, %v3372_v49  ;;  %v3715_v17 = vmul.f32 %v858_v34, %v4692_v44  ;;  %v2581_v9 = vpop.f32.mrb[30].mxu1  ;;  %2366 = vmatprep.subr.bf16.mxu0 %v1117_v43  ;;  %v4774_v49 = vld [vmem:[#allocation47_spill] sm:$0xff] }
 0x209   :  { %v3718_v54 = vmul.f32 %v2581_v9, %v4693_v26  ;;  %v861_v45 = vpop.f32.mrb[31].mxu1  ;;  %2367 = vmatpush3.bf16.msra.mxu0 %v4694_v33  ;;  %v1103_v21 = vmul.f32 %v3708_v5, %v4691_v28  ;;  %v4706_v33 = vld [vmem:[#allocation22_spill] sm:$0xff] }
 0x20a   :  { %v3724_v37 = vmul.f32 %v861_v45, %v4695_v6  ;;  %2368 = vmatprep.subr.bf16.mxu0 %v1118_v19  ;;  %v1072_v62 = vpack.c.bf16 %v1064_v20, %v1063_v3  ;;  %v1101_v43 = vmul.f32 %v3715_v17, %v4692_v44  ;;  %v4697_v19 = vpack.c.bf16 %v3593_v50, %v3589_v18  ;;  %v4703_v18 = vld [vmem:[#allocation94_spill] sm:$0xff]  ;;  %v4704_v50 = vld [vmem:[#allocation96_spill] sm:$0xff]  ;;  %v4705_v45 = vld [vmem:[#allocation29_spill] sm:$0xff] }
 0x20b   :  { %v1104_v34 = vmul.f32 %v3718_v54, %v4693_v26  ;;  %v4698_v20 = vpack.c.bf16 %v3585_v11, %v3581_v12  ;;  %v4701_v12 = vld [vmem:[#allocation25_spill] sm:$0xff]  ;;  %v4702_v11 = vld [vmem:[#allocation18_spill] sm:$0xff] }
 0x20c   :  { %v1102_v9 = vmul.f32 %v3724_v37, %v4695_v6  ;;  %2596 = vmatprep.subr.bf16.mxu1 %v1072_v62 }
 0x20d   :  { %2369 = vmatpush3.bf16.msra.mxu0 %v4696_v7  ;;  %2597 = vmatpush3.bf16.msra.mxu1 %v1072_v62  ;;  %v1120_v42 = vpack.c.bf16 %v1104_v34, %v1103_v21  ;;  %v4707_v62 = vld [vmem:[#allocation98_spill] sm:$0xff]  ;;  %v4708_v21 = vld [vmem:[#allocation99_spill] sm:$0xff]  ;;  %v4712_v7 = vld [vmem:[#allocation101_spill] sm:$0xff] }
 0x20e   :  { %v1119_v3 = vpack.c.bf16 %v1102_v9, %v1101_v43  ;;  %v4709_v34 = vld [vmem:[#allocation34_spill] sm:$0xff]  ;;  %v4711_v9 = vld [vmem:[#allocation100_spill] sm:$0xff] }
 0x20f   :  { %v4710_v43 = vld [vmem:[#allocation26_spill] sm:$0xff] }
 0x210   :  { %2370 = vmatprep.subr.bf16.mxu0 %v1119_v3  ;;  %2599 = vmatmul.mubr.bf16.vlgmr.msra.gmra.mrb[32].mxu1 %v3383_v60  ;;  %v4714_v3 = vld [vmem:[#allocation31_spill] sm:$0xff] }
 0x211   :  { %2371 = vmatpush3.bf16.msra.mxu0 %v4697_v19  ;;  %2602 = vmatprep.mubr.bf16.mxu1 %v3387_v38  ;;  %v4715_v19 = vld [vmem:[#allocation102_spill] sm:$0xff]  ;;  %v4754_v38 = vld [vmem:[#allocation37_spill] sm:$0xff]  ;;  %v4772_v60 = vld [vmem:[#allocation75_spill] sm:$0xff] }
 0x212   :  { %2372 = vmatprep.subr.bf16.mxu0 %v1120_v42  ;;  %v4713_v42 = vld [vmem:[#allocation38_spill] sm:$0xff] }
 0x215   :  { %2373 = vmatpush3.bf16.msra.mxu0 %v4698_v20  ;;  %v4716_v20 = vld [vmem:[#allocation87_spill] sm:$0xff] }
 0x218   :  { %1154 = vmatmul.mubr.bf16.vlgmr.msra.gmra.mrb[32].mxu0 %v2986_v52  ;;  %2603 = vmatmul.mubr.bf16.gmra.mrb[36].mxu1 %v3391_v30 }
 0x219   :  { %2606 = vmatprep.mubr.bf16.mxu1 %v3397_v59  ;;  %1161 = vmatprep.mubr.bf16.mxu0 %v3000_v58  ;;  %v4737_v59 = vld [vmem:[#allocation24_spill] sm:$0xff]  ;;  %v4773_v58 = vld [vmem:[#allocation114_spill] sm:$0xff] }
 0x21a   :  { %v998_v52 = vadd.f32 %v4773_v58, %v4772_v60  ;;  %v159_v60 = vld [vmem:[%s4348_s4 + $0x80] sm:$0xff] }
 0x220   :  { %1162 = vmatmul.mubr.bf16.gmra.mrb[36].mxu0 %v2989_v53  ;;  %2607 = vmatmul.mubr.bf16.gmra.mrb[40].mxu1 %v3401_v29 }
 0x221   :  { %2610 = vmatprep.mubr.bf16.mxu1 %v3407_v39  ;;  %1169 = vmatprep.mubr.bf16.mxu0 %v4699_v13  ;;  %v4753_v13 = vld [vmem:[#allocation108_spill] sm:$0xff] }
 0x228   :  { %1170 = vmatmul.mubr.bf16.gmra.mrb[40].mxu0 %v4700_v0  ;;  %2611 = vmatmul.mubr.bf16.gmra.mrb[44].mxu1 %v3413_v4  ;;  %v4724_v4 = vld [vmem:[#allocation104_spill] sm:$0xff] }
 0x229   :  { %2614 = vmatprep.mubr.bf16.mxu1 %v3395_v48  ;;  %1177 = vmatprep.mubr.bf16.mxu0 %v4701_v12  ;;  %v2690_v48 = vld [vmem:[%s4348_s4 + $0x8] sm:$0xff]  ;;  %v4736_v12 = vld [vmem:[#allocation106_spill] sm:$0xff] }
 0x230   :  { %1178 = vmatmul.mubr.bf16.gmra.mrb[44].mxu0 %v4702_v11  ;;  %2615 = vmatmul.mubr.bf16.gmra.mrb[48].mxu1 %v4703_v18 }
 0x231   :  { %2618 = vmatprep.mubr.bf16.mxu1 %v4704_v50  ;;  %1185 = vmatprep.mubr.bf16.mxu0 %v4705_v45  ;;  %v4717_v50 = vld [vmem:[#allocation41_spill] sm:$0xff] }
 0x238   :  { %1186 = vmatmul.mubr.bf16.gmra.mrb[48].mxu0 %v4706_v33  ;;  %2619 = vmatmul.mubr.bf16.gmra.mrb[52].mxu1 %v4707_v62  ;;  %v4718_v62 = vld [vmem:[#allocation35_spill] sm:$0xff] }
 0x239   :  { %2622 = vmatprep.mubr.bf16.mxu1 %v4708_v21  ;;  %1193 = vmatprep.mubr.bf16.mxu0 %v4709_v34  ;;  %v4719_v21 = vld [vmem:[#allocation11_spill] sm:$0xff] }
 0x240   :  { %1194 = vmatmul.mubr.bf16.gmra.mrb[52].mxu0 %v4710_v43  ;;  %2623 = vmatmul.mubr.bf16.gmra.mrb[56].mxu1 %v4711_v9  ;;  %v4720_v43 = vld [vmem:[#allocation30_spill] sm:$0xff] }
 0x241   :  { %2626 = vmatprep.mubr.bf16.mxu1 %v4712_v7  ;;  %1201 = vmatprep.mubr.bf16.mxu0 %v4713_v42  ;;  %v987_v9 = vadd.f32 %v3447_v16, %v4720_v43  ;;  %v4723_v16 = vld [vmem:[#allocation32_spill] sm:$0xff] }
 0x248   :  { %1202 = vmatmul.mubr.bf16.gmra.mrb[56].mxu0 %v4714_v3  ;;  %2627 = vmatmul.mubr.bf16.gmra.mrb[60].mxu1 %v4715_v19  ;;  %v2688_v3 = vld [vmem:[%s4348_s4] sm:$0xff] }
 0x249   :  { %2646 = vmatprep.mubr.bf16.mxu1 %v4716_v20  ;;  %1209 = vmatprep.mubr.bf16.mxu0 %v4717_v50  ;;  %v985_v19 = vadd.f32 %v2688_v3, %v3452_v24  ;;  %v986_v24 = vadd.f32 %v2690_v48, %v4724_v4 }
 0x250   :  { %1210 = vmatmul.mubr.bf16.gmra.mrb[60].mxu0 %v4718_v62  ;;  %v4721_v62 = vld [vmem:[#allocation103_spill] sm:$0xff] }
 0x251   :  { %1675 = vmatprep.mubr.bf16.mxu0 %v4719_v21  ;;  %v2689_v21 = vld [vmem:[%s4348_s4 + $0x18] sm:$0xff] }
 0x252   :  { %v988_v42 = vadd.f32 %v2689_v21, %v4721_v62 }
 0x2e3   :  { %v2600_v18 = vpop.f32.mrb[32].mxu1 }
 0x2e4   :  { %v1397_v7 = vmul.f32 %v2600_v18, %v3083_v36  ;;  %v1268_v34 = vpop.f32.mrb[33].mxu1 }
 0x2e5   :  { %v1395_v20 = vmul.f32 %v1268_v34, %v2996_v57  ;;  %v2601_v50 = vpop.f32.mrb[34].mxu1  ;;  %v4726_v34 = vld [vmem:[#allocation20_spill] sm:$0xff] }
 0x2e6   :  { %v3787_v33 = vadd.f32 %v1397_v7, %v987_v9  ;;  %v1398_v18 = vmul.f32 %v2601_v50, %v4723_v16  ;;  %v1271_v43 = vpop.f32.mrb[35].mxu1  ;;  %v3798_v11 = vmul.f32 %v1397_v7, %v3083_v36  ;;  %v4734_v36 = vld [vmem:[#allocation52_spill] sm:$0xff] }
 0x2e7   :  { %v3794_v3 = vadd.f32 %v1395_v20, %v985_v19  ;;  %v1396_v45 = vmul.f32 %v1271_v43, %v4726_v34  ;;  %v3806_v50 = vmul.f32 %v1395_v20, %v2996_v57  ;;  %v4729_v19 = vld [vmem:[#allocation50_spill] sm:$0xff] }
 0x2e8   :  { %4722 = vst [vmem:[#allocation65_spill] sm:$0xff] %v3787_v33  ;;  %v3800_v39 = vadd.f32 %v1398_v18, %v988_v42  ;;  %v3803_v62 = vmul.f32 %v1398_v18, %v4723_v16  ;;  %v991_v18 = vadd.f32 %v3485_v55, %v4729_v19  ;;  %v4731_v16 = vld [vmem:[#allocation51_spill] sm:$0xff]  ;;  %v4732_v33 = vld [vmem:[#allocation105_spill] sm:$0xff] }
 0x2e9   :  { %4725 = vst [vmem:[#allocation57_spill] sm:$0xff] %v3794_v3  ;;  %v3808_v9 = vadd.f32 %v1396_v45, %v986_v24  ;;  %v3811_v21 = vmul.f32 %v1396_v45, %v4726_v34  ;;  %v4730_v24 = vld [vmem:[#allocation42_spill] sm:$0xff]  ;;  %v992_v48 = vadd.f32 %v4732_v33, %v4731_v16  ;;  %v4741_v16 = vld [vmem:[#allocation44_spill] sm:$0xff] }
 0x2ea   :  { %4727 = vst [vmem:[#allocation64_spill] sm:$0xff] %v3800_v39 }
 0x2eb   :  { %4728 = vst [vmem:[#allocation81_spill] sm:$0xff] %v3808_v9  ;;  %v2374_v7 = vpop.f32.mrb[32].mxu0  ;;  %v2604_v42 = vpop.f32.mrb[36].mxu1  ;;  %v989_v9 = vadd.f32 %v3490_v61, %v4730_v24 }
 0x2ec   :  { %v1401_v43 = vmul.f32 %v2604_v42, %v3192_v51  ;;  %v2375_v20 = vpop.f32.mrb[33].mxu0  ;;  %v1284_v39 = vpop.f32.mrb[37].mxu1  ;;  %v4735_v42 = vld [vmem:[#allocation43_spill] sm:$0xff] }
 0x2ed   :  { %v2376_v45 = vadd.f32 %v2375_v20, %v2374_v7  ;;  %v1399_v34 = vmul.f32 %v1284_v39, %v3143_v8  ;;  %v2377_v3 = vpop.f32.mrb[34].mxu0  ;;  %v2605_v4 = vpop.f32.mrb[38].mxu1  ;;  %v990_v0 = vadd.f32 %v4736_v12, %v4735_v42 }
 0x2ee   :  { %v3825_v57 = vadd.f32 %v1401_v43, %v991_v18  ;;  %v1402_v29 = vmul.f32 %v2605_v4, %v4734_v36  ;;  %v2378_v55 = vpop.f32.mrb[35].mxu0  ;;  %v1287_v19 = vpop.f32.mrb[39].mxu1  ;;  %v3836_v7 = vmul.f32 %v1401_v43, %v3192_v51  ;;  %v4742_v18 = vld [vmem:[#allocation23_spill] sm:$0xff] }
 0x2ef   :  { %v3831_v30 = vmul.f32 %v2376_v45, %v4737_v59  ;;  %v3833_v61 = vadd.f32 %v1399_v34, %v989_v9  ;;  %v2379_v39 = vadd.f32 %v2378_v55, %v2377_v3  ;;  %v1400_v4 = vmul.f32 %v1287_v19, %v4741_v16  ;;  %v4745_v19 = vld [vmem:[#allocation66_spill] sm:$0xff]  ;;  %v4748_v51 = vld [vmem:[#allocation67_spill] sm:$0xff] }
 0x2f0   :  { %4733 = vst [vmem:[#allocation73_spill] sm:$0xff] %v3825_v57  ;;  %v3838_v20 = vadd.f32 %v1402_v29, %v992_v48  ;;  %v3841_v33 = vmul.f32 %v1402_v29, %v4734_v36  ;;  %v3848_v12 = vmul.f32 %v1399_v34, %v3143_v8  ;;  %v995_v34 = vadd.f32 %v3523_v35, %v4745_v19  ;;  %v4751_v19 = vld [vmem:[#allocation68_spill] sm:$0xff] }
 0x2f1   :  { %4738 = vst [vmem:[#allocation80_spill] sm:$0xff] %v3831_v30  ;;  %4739 = vst [vmem:[#allocation72_spill] sm:$0xff] %v3833_v61  ;;  %v3845_v24 = vmul.f32 %v2379_v39, %v4742_v18  ;;  %v3852_v3 = vadd.f32 %v1400_v4, %v990_v0  ;;  %v3855_v43 = vmul.f32 %v1400_v4, %v4741_v16  ;;  %v4746_v4 = vld [vmem:[#allocation58_spill] sm:$0xff]  ;;  %v4747_v16 = vld [vmem:[#allocation61_spill] sm:$0xff] }
 0x2f2   :  { %4740 = vst [vmem:[#allocation87_spill] sm:$0xff] %v3838_v20  ;;  %v1571_v29 = vmul.f32 %v3831_v30, %v4737_v59  ;;  %v4752_v30 = vld [vmem:[#allocation59_spill] sm:$0xff] }
 0x2f3   :  { %4743 = vst [vmem:[#allocation11_spill] sm:$0xff] %v3845_v24  ;;  %4744 = vst [vmem:[#allocation30_spill] sm:$0xff] %v3852_v3  ;;  %v1572_v48 = vmul.f32 %v3845_v24, %v4742_v18  ;;  %v2380_v45 = vpop.f32.mrb[36].mxu0  ;;  %v2608_v55 = vpop.f32.mrb[40].mxu1  ;;  %v993_v3 = vadd.f32 %v3528_v14, %v4746_v4  ;;  %v4749_v18 = vld [vmem:[#allocation107_spill] sm:$0xff]  ;;  %v994_v53 = vadd.f32 %v4753_v13, %v4752_v30 }
 0x2f4   :  { %v1405_v0 = vmul.f32 %v2608_v55, %v3276_v31  ;;  %v2381_v39 = vpop.f32.mrb[37].mxu0  ;;  %v1300_v9 = vpop.f32.mrb[41].mxu1  ;;  %v996_v24 = vadd.f32 %v4749_v18, %v4748_v51 }
 0x2f5   :  { %v2382_v20 = vadd.f32 %v2381_v39, %v2380_v45  ;;  %v1403_v61 = vmul.f32 %v1300_v9, %v4747_v16  ;;  %v2383_v36 = vpop.f32.mrb[38].mxu0  ;;  %v2609_v57 = vpop.f32.mrb[42].mxu1  ;;  %v1587_v8 = vpack.c.bf16 %v1572_v48, %v1571_v29  ;;  %v4763_v39 = vld [vmem:[#allocation111_spill] sm:$0xff] }
 0x2f6   :  { %v3871_v35 = vadd.f32 %v1405_v0, %v995_v34  ;;  %v1406_v42 = vmul.f32 %v2609_v57, %v4751_v19  ;;  %v2384_v59 = vpop.f32.mrb[39].mxu0  ;;  %v1303_v55 = vpop.f32.mrb[43].mxu1  ;;  %v3882_v29 = vmul.f32 %v1405_v0, %v3276_v31  ;;  %v4758_v57 = vld [vmem:[#allocation60_spill] sm:$0xff]  ;;  %v4762_v0 = vld [vmem:[#allocation82_spill] sm:$0xff] }
 0x2f7   :  { %v3877_v14 = vmul.f32 %v2382_v20, %v4754_v38  ;;  %v3879_v45 = vadd.f32 %v1403_v61, %v993_v3  ;;  %v2385_v9 = vadd.f32 %v2384_v59, %v2383_v36  ;;  %2630 = vmatprep.subr.bf16.mxu1 %v1587_v8  ;;  %v1404_v48 = vmul.f32 %v1303_v55, %v4758_v57  ;;  %v4759_v34 = vld [vmem:[#allocation36_spill] sm:$0xff]  ;;  %v4764_v55 = vld [vmem:[#allocation85_spill] sm:$0xff] }
 0x2f8   :  { %4750 = vst [vmem:[#allocation103_spill] sm:$0xff] %v3871_v35  ;;  %v3884_v51 = vadd.f32 %v1406_v42, %v996_v24  ;;  %v3887_v18 = vmul.f32 %v1406_v42, %v4751_v19  ;;  %2631 = vmatpush3.bf16.msra.mxu1 %v1587_v8  ;;  %v3894_v13 = vmul.f32 %v1403_v61, %v4747_v16 }
 0x2f9   :  { %4755 = vst [vmem:[#allocation104_spill] sm:$0xff] %v3877_v14  ;;  %4756 = vst [vmem:[#allocation50_spill] sm:$0xff] %v3879_v45  ;;  %v3891_v30 = vmul.f32 %v2385_v9, %v4759_v34  ;;  %v3898_v59 = vadd.f32 %v1404_v48, %v994_v53  ;;  %v3901_v20 = vmul.f32 %v1404_v48, %v4758_v57  ;;  %v4765_v48 = vld [vmem:[#allocation74_spill] sm:$0xff]  ;;  %v4767_v45 = vld [vmem:[#allocation77_spill] sm:$0xff] }
 0x2fa   :  { %4757 = vst [vmem:[#allocation42_spill] sm:$0xff] %v3884_v51  ;;  %v1573_v24 = vmul.f32 %v3877_v14, %v4754_v38  ;;  %v999_v61 = vadd.f32 %v4763_v39, %v4762_v0  ;;  %v4771_v39 = vld [vmem:[#allocation84_spill] sm:$0xff] }
 0x2fb   :  { %4760 = vst [vmem:[#allocation51_spill] sm:$0xff] %v3891_v30  ;;  %4761 = vst [vmem:[#allocation105_spill] sm:$0xff] %v3898_v59  ;;  %v1574_v8 = vmul.f32 %v3891_v30, %v4759_v34  ;;  %v2386_v3 = vpop.f32.mrb[40].mxu0  ;;  %v2612_v42 = vpop.f32.mrb[44].mxu1  ;;  %v4766_v59 = vld [vmem:[#allocation112_spill] sm:$0xff]  ;;  %v4768_v34 = vld [vmem:[#allocation83_spill] sm:$0xff] }
 0x2fc   :  { %v1409_v53 = vmul.f32 %v2612_v42, %v4764_v55  ;;  %v2387_v9 = vpop.f32.mrb[41].mxu0  ;;  %v1316_v36 = vpop.f32.mrb[45].mxu1  ;;  %v997_v51 = vadd.f32 %v4766_v59, %v4765_v48  ;;  %v4769_v30 = vld [vmem:[#allocation113_spill] sm:$0xff] }
 0x2fd   :  { %v2388_v57 = vadd.f32 %v2387_v9, %v2386_v3  ;;  %v1407_v19 = vmul.f32 %v1316_v36, %v4767_v45  ;;  %v2389_v35 = vpop.f32.mrb[42].mxu0  ;;  %v2613_v16 = vpop.f32.mrb[46].mxu1  ;;  %v1588_v31 = vpack.c.bf16 %v1574_v8, %v1573_v24  ;;  %v1000_v38 = vadd.f32 %v4769_v30, %v4768_v34  ;;  %v4786_v48 = vld [vmem:[#allocation117_spill] sm:$0xff] }
 0x2fe   :  { %v3917_v0 = vadd.f32 %v1409_v53, %v999_v61  ;;  %v1410_v4 = vmul.f32 %v2613_v16, %v4771_v39  ;;  %v2390_v14 = vpop.f32.mrb[43].mxu0  ;;  %v1319_v42 = vpop.f32.mrb[47].mxu1  ;;  %v3928_v24 = vmul.f32 %v1409_v53, %v4764_v55  ;;  %v4779_v16 = vld [vmem:[#allocation76_spill] sm:$0xff]  ;;  %v4780_v61 = vld [vmem:[#allocation46_spill] sm:$0xff] }
 0x2ff   :  { %v3923_v59 = vmul.f32 %v2388_v57, %v4774_v49  ;;  %v3925_v3 = vadd.f32 %v1407_v19, %v997_v51  ;;  %v2391_v36 = vadd.f32 %v2390_v14, %v2389_v35  ;;  %2632 = vmatprep.subr.bf16.mxu1 %v1588_v31  ;;  %v1408_v8 = vmul.f32 %v1319_v42, %v4779_v16  ;;  %v4783_v42 = vld [vmem:[#allocation28_spill] sm:$0xff] }
 0x300   :  { %4770 = vst [vmem:[#allocation43_spill] sm:$0xff] %v3917_v0  ;;  %4777 = vst [vmem:[#allocation58_spill] sm:$0xff] %v3928_v24  ;;  %v3930_v34 = vadd.f32 %v1410_v4, %v1000_v38  ;;  %v3933_v30 = vmul.f32 %v1410_v4, %v4771_v39  ;;  %2633 = vmatpush3.bf16.msra.mxu1 %v1588_v31  ;;  %v3943_v35 = vmul.f32 %v1407_v19, %v4767_v45  ;;  %v2691_v19 = vld [vmem:[%s4348_s4 + $0x90] sm:$0xff] }
 0x301   :  { %4775 = vst [vmem:[#allocation106_spill] sm:$0xff] %v3923_v59  ;;  %4776 = vst [vmem:[#allocation66_spill] sm:$0xff] %v3925_v3  ;;  %v3937_v58 = vmul.f32 %v2391_v36, %v4780_v61  ;;  %v3947_v14 = vadd.f32 %v1408_v8, %v998_v52  ;;  %v3950_v51 = vmul.f32 %v1408_v8, %v4779_v16  ;;  %v160_v52 = vld [vmem:[%s4348_s4 + $0x88] sm:$0xff]  ;;  %v4784_v16 = vld [vmem:[#allocation15_spill] sm:$0xff] }
 0x302   :  { %4778 = vst [vmem:[#allocation67_spill] sm:$0xff] %v3930_v34  ;;  %v1575_v31 = vmul.f32 %v3923_v59, %v4774_v49  ;;  %v1003_v9 = vadd.f32 %v2691_v19, %v3606_v15  ;;  %v2692_v15 = vld [vmem:[%s4347_s3 + $0x30] sm:$0xff] }
 0x303   :  { %4781 = vst [vmem:[#allocation107_spill] sm:$0xff] %v3937_v58  ;;  %4782 = vst [vmem:[#allocation59_spill] sm:$0xff] %v3947_v14  ;;  %v1576_v57 = vmul.f32 %v3937_v58, %v4780_v61  ;;  %v2392_v4 = vpop.f32.mrb[44].mxu0  ;;  %v2616_v53 = vpop.f32.mrb[48].mxu1  ;;  %v1001_v14 = vadd.f32 %v3611_v47, %v159_v60  ;;  %v4785_v19 = vld [vmem:[#allocation109_spill] sm:$0xff]  ;;  %v4788_v47 = vld [vmem:[#allocation27_spill] sm:$0xff] }
 0x304   :  { %v1413_v36 = vmul.f32 %v2616_v53, %v4783_v42  ;;  %v2393_v8 = vpop.f32.mrb[45].mxu0  ;;  %v1332_v38 = vpop.f32.mrb[49].mxu1  ;;  %v927_v55 = vadd.f32 %v2692_v15, %v4785_v19  ;;  %v2693_v53 = vld [vmem:[%s4348_s4 + $0x98] sm:$0xff] }
 0x305   :  { %v2394_v34 = vadd.f32 %v2393_v8, %v2392_v4  ;;  %v1411_v3 = vmul.f32 %v1332_v38, %v4784_v16  ;;  %v2395_v39 = vpop.f32.mrb[46].mxu0  ;;  %v2617_v0 = vpop.f32.mrb[50].mxu1  ;;  %v1589_v45 = vpack.c.bf16 %v1576_v57, %v1575_v31  ;;  %v1004_v61 = vadd.f32 %v2693_v53, %v4786_v48  ;;  %v4789_v8 = vld [vmem:[#allocation118_spill] sm:$0xff]  ;;  %v4790_v57 = vld [vmem:[#allocation55_spill] sm:$0xff] }
 0x306   :  { %v3976_v58 = vadd.f32 %v1413_v36, %v1003_v9  ;;  %v1414_v60 = vmul.f32 %v2617_v0, %v4788_v47  ;;  %v2396_v38 = vpop.f32.mrb[47].mxu0  ;;  %v1335_v4 = vpop.f32.mrb[51].mxu1  ;;  %v1002_v31 = vadd.f32 %v4789_v8, %v160_v52  ;;  %v1613_v15 = vmul.f32 %v1413_v36, %v4783_v42  ;;  %v4793_v9 = vld [vmem:[#allocation19_spill] sm:$0xff]  ;;  %v2694_v0 = vld [vmem:[%s4347_s3 + $0x38] sm:$0xff] }
 0x307   :  { %v1224_v49 = vmul.f32 %v2394_v34, %v4790_v57  ;;  %v3981_v59 = vadd.f32 %v1411_v3, %v1001_v14  ;;  %v2397_v24 = vadd.f32 %v2396_v38, %v2395_v39  ;;  %2634 = vmatprep.subr.bf16.mxu1 %v1589_v45  ;;  %v1412_v53 = vmul.f32 %v1335_v4, %v4793_v9  ;;  %v4794_v52 = vld [vmem:[#allocation110_spill] sm:$0xff]  ;;  %v164_v4 = vld [vmem:[%s4348_s4 + $0xa8] sm:$0xff] }
 0x308   :  { %4787 = vst [vmem:[#allocation108_spill] sm:$0xff] %v3976_v58  ;;  %v3984_v19 = vadd.f32 %v1414_v60, %v1004_v61  ;;  %v1614_v48 = vmul.f32 %v1414_v60, %v4788_v47  ;;  %2635 = vmatpush3.bf16.msra.mxu1 %v1589_v45  ;;  %v928_v8 = vadd.f32 %v2694_v0, %v4794_v52  ;;  %v4796_v14 = vld [vmem:[#allocation54_spill] sm:$0xff]  ;;  %v163_v61 = vld [vmem:[%s4348_s4 + $0xa0] sm:$0xff]  ;;  %v4800_v47 = vld [vmem:[#allocation40_spill] sm:$0xff] }
 0x309   :  { %4791 = vst [vmem:[#allocation82_spill] sm:$0xff] %v3981_v59  ;;  %v3992_v34 = vadd.f32 %v1224_v49, %v927_v55  ;;  %v1225_v39 = vmul.f32 %v2397_v24, %v4796_v14  ;;  %v1611_v36 = vmul.f32 %v1411_v3, %v4784_v16  ;;  %v3999_v60 = vadd.f32 %v1412_v53, %v1002_v31  ;;  %v2695_v3 = vld [vmem:[%s4347_s3 + $0x40] sm:$0xff] }
 0x30a   :  { %4792 = vst [vmem:[#allocation111_spill] sm:$0xff] %v3984_v19  ;;  %v1612_v45 = vmul.f32 %v1412_v53, %v4793_v9  ;;  %v1636_v38 = vpack.c.bf16 %v1614_v48, %v1613_v15  ;;  %v1577_v55 = vmul.f32 %v1224_v49, %v4790_v57  ;;  %v4799_v31 = vld [vmem:[#allocation115_spill] sm:$0xff]  ;;  %v2696_v15 = vld [vmem:[%s4348_s4 + $0xb0] sm:$0xff] }
 0x30b   :  { %4795 = vst [vmem:[#allocation74_spill] sm:$0xff] %v3992_v34  ;;  %4797 = vst [vmem:[#allocation112_spill] sm:$0xff] %v3999_v60  ;;  %v4006_v0 = vadd.f32 %v1225_v39, %v928_v8  ;;  %v1578_v24 = vmul.f32 %v1225_v39, %v4796_v14  ;;  %v2398_v52 = vpop.f32.mrb[48].mxu0  ;;  %v2620_v19 = vpop.f32.mrb[52].mxu1  ;;  %v929_v60 = vadd.f32 %v2695_v3, %v4799_v31  ;;  %v2697_v3 = vld [vmem:[%s4348_s4 + $0xb8] sm:$0xff]  ;;  %v4801_v31 = vld [vmem:[#allocation49_spill] sm:$0xff] }
 0x30c   :  { %v1007_v48 = vadd.f32 %v2696_v15, %v3636_v32  ;;  %v1417_v49 = vmul.f32 %v2620_v19, %v4673_v46  ;;  %v2399_v53 = vpop.f32.mrb[49].mxu0  ;;  %v1348_v8 = vpop.f32.mrb[53].mxu1  ;;  %v1635_v9 = vpack.c.bf16 %v1612_v45, %v1611_v36  ;;  %v1005_v39 = vadd.f32 %v3641_v10, %v163_v61  ;;  %v4802_v32 = vld [vmem:[#allocation121_spill] sm:$0xff]  ;;  %v4803_v34 = vld [vmem:[#allocation48_spill] sm:$0xff] }
 0x30d   :  { %4798 = vst [vmem:[#allocation83_spill] sm:$0xff] %v4006_v0  ;;  %v2400_v59 = vadd.f32 %v2399_v53, %v2398_v52  ;;  %v1415_v58 = vmul.f32 %v1348_v8, %v4800_v47  ;;  %v2401_v16 = vpop.f32.mrb[50].mxu0  ;;  %v2621_v42 = vpop.f32.mrb[54].mxu1  ;;  %v1590_v0 = vpack.c.bf16 %v1578_v24, %v1577_v55  ;;  %v1008_v14 = vadd.f32 %v2697_v3, %v4801_v31  ;;  %v4804_v52 = vld [vmem:[#allocation63_spill] sm:$0xff] }
 0x30e   :  { %v1006_v15 = vadd.f32 %v4802_v32, %v164_v4  ;;  %v4025_v19 = vadd.f32 %v1417_v49, %v1007_v48  ;;  %v1418_v36 = vmul.f32 %v2621_v42, %v4803_v34  ;;  %2446 = vmatprep.subr.bf16.mxu0 %v1635_v9  ;;  %v2402_v10 = vpop.f32.mrb[51].mxu0  ;;  %v1351_v61 = vpop.f32.mrb[55].mxu1  ;;  %v1617_v45 = vmul.f32 %v1417_v49, %v4673_v46  ;;  %v4807_v48 = vld [vmem:[#allocation39_spill] sm:$0xff]  ;;  %v2698_v9 = vld [vmem:[%s4347_s3 + $0x48] sm:$0xff] }
 0x30f   :  { %v1226_v53 = vmul.f32 %v2400_v59, %v4804_v52  ;;  %v4030_v55 = vadd.f32 %v1415_v58, %v1005_v39  ;;  %v2403_v24 = vadd.f32 %v2402_v10, %v2401_v16  ;;  %v4805_v8 = vpack.c.bf16 %v3811_v21, %v3806_v50  ;;  %2636 = vmatprep.subr.bf16.mxu1 %v1590_v0  ;;  %v4808_v59 = vld [vmem:[#allocation116_spill] sm:$0xff]  ;;  %v4809_v16 = vld [vmem:[#allocation62_spill] sm:$0xff]  ;;  %v167_v50 = vld [vmem:[%s4348_s4 + $0xc0] sm:$0xff] }
 0x310   :  { %v4035_v3 = vadd.f32 %v1418_v36, %v1008_v14  ;;  %v1618_v4 = vmul.f32 %v1418_v36, %v4803_v34  ;;  %v1416_v42 = vmul.f32 %v1351_v61, %v4807_v48  ;;  %v930_v49 = vadd.f32 %v2698_v9, %v4808_v59  ;;  %2637 = vmatpush3.bf16.msra.mxu1 %v1590_v0  ;;  %v168_v36 = vld [vmem:[%s4348_s4 + $0xc8] sm:$0xff] }
 0x311   :  { %2447 = vmatpush3.bf16.msra.mxu0 %v4805_v8  ;;  %v4043_v39 = vadd.f32 %v1226_v53, %v929_v60  ;;  %v1227_v31 = vmul.f32 %v2403_v24, %v4809_v16  ;;  %v1615_v21 = vmul.f32 %v1415_v58, %v4800_v47  ;;  %v1579_v60 = vmul.f32 %v1226_v53, %v4804_v52  ;;  %v4812_v24 = vld [vmem:[#allocation119_spill] sm:$0xff]  ;;  %v2700_v53 = vld [vmem:[%s4348_s4 + $0xd0] sm:$0xff] }
 0x312   :  { %4806 = vst [vmem:[#allocation113_spill] sm:$0xff] %v4035_v3  ;;  %2448 = vmatprep.subr.bf16.mxu0 %v1636_v38  ;;  %v4050_v14 = vadd.f32 %v1416_v42, %v1006_v15  ;;  %v1616_v38 = vmul.f32 %v1416_v42, %v4807_v48  ;;  %v1638_v32 = vpack.c.bf16 %v1618_v4, %v1617_v45  ;;  %v2699_v45 = vld [vmem:[%s4347_s3 + $0x50] sm:$0xff] }
 0x313   :  { %v4057_v10 = vadd.f32 %v1227_v31, %v930_v49  ;;  %v1580_v0 = vmul.f32 %v1227_v31, %v4809_v16  ;;  %v4811_v61 = vpack.c.bf16 %v3803_v62, %v3798_v11  ;;  %v2404_v58 = vpop.f32.mrb[52].mxu0  ;;  %v2624_v15 = vpop.f32.mrb[56].mxu1  ;;  %v931_v8 = vadd.f32 %v2699_v45, %v4812_v24  ;;  %v2701_v45 = vld [vmem:[%s4348_s4 + $0xd8] sm:$0xff] }
 0x314   :  { %4810 = vst [vmem:[#allocation75_spill] sm:$0xff] %v4050_v14  ;;  %v1011_v4 = vadd.f32 %v2700_v53, %v3672_v1  ;;  %v1421_v42 = vmul.f32 %v2624_v15, %v4685_v63  ;;  %v2405_v9 = vpop.f32.mrb[53].mxu0  ;;  %v1364_v59 = vpop.f32.mrb[57].mxu1  ;;  %v1637_v11 = vpack.c.bf16 %v1616_v38, %v1615_v21  ;;  %v1009_v62 = vadd.f32 %v3677_v22, %v167_v50 }
 0x315   :  { %2449 = vmatpush3.bf16.msra.mxu0 %v4811_v61  ;;  %v2406_v49 = vadd.f32 %v2405_v9, %v2404_v58  ;;  %v1419_v31 = vmul.f32 %v1364_v59, %v4686_v23  ;;  %v2407_v61 = vpop.f32.mrb[54].mxu0  ;;  %v2625_v14 = vpop.f32.mrb[58].mxu1  ;;  %v1591_v3 = vpack.c.bf16 %v1580_v0, %v1579_v60  ;;  %v1012_v24 = vadd.f32 %v2701_v45, %v3682_v41  ;;  %v4813_v58 = vld [vmem:[#allocation71_spill] sm:$0xff] }
 0x316   :  { %v1010_v1 = vadd.f32 %v3688_v56, %v168_v36  ;;  %v4079_v15 = vadd.f32 %v1421_v42, %v1011_v4  ;;  %v1422_v21 = vmul.f32 %v2625_v14, %v4687_v27  ;;  %2450 = vmatprep.subr.bf16.mxu0 %v1637_v11  ;;  %v2408_v22 = vpop.f32.mrb[55].mxu0  ;;  %v1367_v50 = vpop.f32.mrb[59].mxu1  ;;  %v1621_v38 = vmul.f32 %v1421_v42, %v4685_v63  ;;  %v4815_v36 = vld [vmem:[#allocation56_spill] sm:$0xff]  ;;  %v2702_v4 = vld [vmem:[%s4347_s3 + $0x58] sm:$0xff] }
 0x317   :  { %v1228_v53 = vmul.f32 %v2406_v49, %v4813_v58  ;;  %v4084_v60 = vadd.f32 %v1419_v31, %v1009_v62  ;;  %v2409_v0 = vadd.f32 %v2408_v22, %v2407_v61  ;;  %v4814_v9 = vpack.c.bf16 %v3855_v43, %v3848_v12  ;;  %2638 = vmatprep.subr.bf16.mxu1 %v1591_v3  ;;  %v4816_v42 = vld [vmem:[#allocation120_spill] sm:$0xff]  ;;  %v4817_v62 = vld [vmem:[#allocation70_spill] sm:$0xff]  ;;  %v171_v12 = vld [vmem:[%s4348_s4 + $0xe0] sm:$0xff] }
 0x318   :  { %v4089_v41 = vadd.f32 %v1422_v21, %v1012_v24  ;;  %v1622_v56 = vmul.f32 %v1422_v21, %v4687_v27  ;;  %v1420_v14 = vmul.f32 %v1367_v50, %v4815_v36  ;;  %v932_v59 = vadd.f32 %v2702_v4, %v4816_v42  ;;  %2639 = vmatpush3.bf16.msra.mxu1 %v1591_v3  ;;  %v172_v24 = vld [vmem:[%s4348_s4 + $0xe8] sm:$0xff]  ;;  %v2703_v50 = vld [vmem:[%s4347_s3 + $0x60] sm:$0xff] }
 0x319   :  { %2451 = vmatpush3.bf16.msra.mxu0 %v4814_v9  ;;  %v4097_v11 = vadd.f32 %v1228_v53, %v931_v8  ;;  %v1229_v49 = vmul.f32 %v2409_v0, %v4817_v62  ;;  %v1619_v43 = vmul.f32 %v1419_v31, %v4686_v23  ;;  %v1581_v8 = vmul.f32 %v1228_v53, %v4813_v58  ;;  %v2704_v53 = vld [vmem:[%s4348_s4 + $0xf0] sm:$0xff] }
 0x31a   :  { %2452 = vmatprep.subr.bf16.mxu0 %v1638_v32  ;;  %v4104_v61 = vadd.f32 %v1420_v14, %v1010_v1  ;;  %v1620_v32 = vmul.f32 %v1420_v14, %v4815_v36  ;;  %v1640_v45 = vpack.c.bf16 %v1622_v56, %v1621_v38  ;;  %v4819_v22 = vpack.c.bf16 %v3841_v33, %v3836_v7  ;;  %v4820_v38 = vld [vmem:[#allocation122_spill] sm:$0xff] }
 0x31b   :  { %v4111_v21 = vadd.f32 %v1229_v49, %v932_v59  ;;  %v1582_v3 = vmul.f32 %v1229_v49, %v4817_v62  ;;  %v2410_v31 = vpop.f32.mrb[56].mxu0  ;;  %v2628_v1 = vpop.f32.mrb[60].mxu1  ;;  %v933_v0 = vadd.f32 %v2703_v50, %v4820_v38  ;;  %v1015_v9 = vadd.f32 %v2704_v53, %v3708_v5  ;;  %v2705_v50 = vld [vmem:[%s4348_s4 + $0xf8] sm:$0xff] }
 0x31c   :  { %4818 = vst [vmem:[#allocation114_spill] sm:$0xff] %v4104_v61  ;;  %v1425_v56 = vmul.f32 %v2628_v1, %v4691_v28  ;;  %v2411_v14 = vpop.f32.mrb[57].mxu0  ;;  %v1380_v4 = vpop.f32.mrb[61].mxu1  ;;  %v1639_v7 = vpack.c.bf16 %v1620_v32, %v1619_v43  ;;  %v1013_v33 = vadd.f32 %v3715_v17, %v171_v12  ;;  %v1016_v38 = vadd.f32 %v2705_v50, %v3718_v54 }
 0x31d   :  { %2453 = vmatpush3.bf16.msra.mxu0 %v4819_v22  ;;  %v2412_v42 = vadd.f32 %v2411_v14, %v2410_v31  ;;  %v1423_v59 = vmul.f32 %v1380_v4, %v4692_v44  ;;  %v2413_v49 = vpop.f32.mrb[58].mxu0  ;;  %v2629_v22 = vpop.f32.mrb[62].mxu1  ;;  %v1592_v61 = vpack.c.bf16 %v1582_v3, %v1581_v8  ;;  %v1014_v5 = vadd.f32 %v3724_v37, %v172_v24  ;;  %v4821_v31 = vld [vmem:[#allocation79_spill] sm:$0xff] }
 0x31e   :  { %v4133_v1 = vadd.f32 %v1425_v56, %v1015_v9  ;;  %v1426_v43 = vmul.f32 %v2629_v22, %v4693_v26  ;;  %2454 = vmatprep.subr.bf16.mxu0 %v1639_v7  ;;  %v2414_v17 = vpop.f32.mrb[59].mxu0  ;;  %v1383_v12 = vpop.f32.mrb[63].mxu1  ;;  %v1625_v32 = vmul.f32 %v1425_v56, %v4691_v28  ;;  %v4822_v14 = vpack.c.bf16 %v3901_v20, %v3894_v13  ;;  %v2706_v9 = vld [vmem:[%s4347_s3 + $0x68] sm:$0xff]  ;;  %v4823_v56 = vld [vmem:[#allocation123_spill] sm:$0xff] }
 0x31f   :  { %v1230_v53 = vmul.f32 %v2412_v42, %v4821_v31  ;;  %v4138_v8 = vadd.f32 %v1423_v59, %v1013_v33  ;;  %v2415_v3 = vadd.f32 %v2414_v17, %v2413_v49  ;;  %v1424_v24 = vmul.f32 %v1383_v12, %v4695_v6  ;;  %2640 = vmatprep.subr.bf16.mxu1 %v1592_v61  ;;  %v4824_v33 = vld [vmem:[#allocation78_spill] sm:$0xff] }
 0x320   :  { %v4143_v54 = vadd.f32 %v1426_v43, %v1016_v38  ;;  %v1626_v37 = vmul.f32 %v1426_v43, %v4693_v26  ;;  %v934_v4 = vadd.f32 %v2706_v9, %v4823_v56  ;;  %2641 = vmatpush3.bf16.msra.mxu1 %v1592_v61  ;;  %v1623_v13 = vmul.f32 %v1423_v59, %v4692_v44  ;;  %v4827_v56 = vld [vmem:[#allocation86_spill] sm:$0xff] }
 0x321   :  { %2455 = vmatpush3.bf16.msra.mxu0 %v4822_v14  ;;  %v4151_v7 = vadd.f32 %v1230_v53, %v933_v0  ;;  %v1231_v42 = vmul.f32 %v2415_v3, %v4824_v33  ;;  %v4155_v20 = vadd.f32 %v1424_v24, %v1014_v5  ;;  %v1624_v49 = vmul.f32 %v1424_v24, %v4695_v6 }
 0x322   :  { %2456 = vmatprep.subr.bf16.mxu0 %v1640_v45  ;;  %v1642_v22 = vpack.c.bf16 %v1626_v37, %v1625_v32  ;;  %v1583_v45 = vmul.f32 %v1230_v53, %v4821_v31  ;;  %v4825_v0 = vpack.c.bf16 %v3887_v18, %v3882_v29  ;;  %v2707_v32 = vld [vmem:[%s4347_s3 + $0x70] sm:$0xff]  ;;  %v4826_v29 = vpack.c.bf16 %v3950_v51, %v3943_v35  ;;  %v2708_v18 = vld [vmem:[%s4347_s3 + $0x78] sm:$0xff]  ;;  %s2785_s3 = smov [#allocation5]  }
 0x323   :  { %v4159_v50 = vadd.f32 %v1231_v42, %v934_v4  ;;  %v1584_v38 = vmul.f32 %v1231_v42, %v4824_v33  ;;  %v2416_v43 = vpop.f32.mrb[60].mxu0  ;;  %v1641_v61 = vpack.c.bf16 %v1624_v49, %v1623_v13  ;;  %v935_v53 = vadd.f32 %v2707_v32, %v3697_v2  ;;  %v4828_v51 = vld [vmem:[#allocation58_spill] sm:$0xff]  ;;  %v4843_v32 = vld [vmem:[#allocation29_spill] sm:$0xff]  ;;  %s2242_s22 = sshll.u32 %s2785_s3, 4  ;;  %s2243_s22 = int_to_ptr.vmem [resolvable:$true] %s2242_s22 }
 0x324   :  { %v2417_v17 = vpop.f32.mrb[61].mxu0  ;;  %v936_v24 = vadd.f32 %v2708_v18, %v3705_v25  ;;  %v4829_v13 = vpack.c.bf16 %v3933_v30, %v4828_v51  ;;  %v4832_v25 = vld [vmem:[#allocation88_spill] sm:$0xff]  ;;  %v4838_v30 = vld [vmem:[#allocation14_spill] sm:$0xff]  ;;  %v4853_v51 = vld [vmem:[#allocation99_spill] sm:$0xff]  ;;  %s2731_s25 = scalar_lea.vmem %s2243_s22, 2048  ;;  %p2736_p9 = scmp.lt.s32.totalorder %s2243_s22, %s2243_s22 }
 0x325   :  { %2457 = vmatpush3.bf16.msra.mxu0 %v4825_v0  ;;  %v2418_v12 = vadd.f32 %v2417_v17, %v2416_v43  ;;  %v2419_v59 = vpop.f32.mrb[62].mxu0  ;;  %v1593_v5 = vpack.c.bf16 %v1584_v38, %v1583_v45  ;;  %v4831_v45 = vld [vmem:[#allocation17_spill] sm:$0xff]  ;;  %v4836_v17 = vld [vmem:[#allocation90_spill] sm:$0xff]  ;;  %p2732_p8 = scmp.ne.s32.totalorder %s2243_s22, %s2731_s25  ;;  %p2737_p10 = scmp.lt.s32.totalorder %s2731_s25, %s2731_s25 }
 0x326   :  { %2458 = vmatprep.subr.bf16.mxu0 %v1641_v61  ;;  %v2420_v3 = vpop.f32.mrb[63].mxu0  ;;  %v4833_v38 = vld [vmem:[#allocation89_spill] sm:$0xff]  ;;  %v4837_v61 = vld [vmem:[#allocation92_spill] sm:$0xff]  ;;  %v4848_v18 = vld [vmem:[#allocation94_spill] sm:$0xff] }
 0x327   :  { %v1232_v14 = vmul.f32 %v2418_v12, %v3374_v40  ;;  %v2421_v37 = vadd.f32 %v2420_v3, %v2419_v59  ;;  %2642 = vmatprep.subr.bf16.mxu1 %v1593_v5  ;;  %v4834_v0 = vld [vmem:[#allocation13_spill] sm:$0xff]  ;;  %v4842_v3 = vld [vmem:[#allocation18_spill] sm:$0xff]  ;;  %p2738_p11 = por %p2737_p10, %p2736_p9 }
 0x328   :  { %2643 = vmatpush3.bf16.msra.mxu1 %v1593_v5  ;;  %v4835_v43 = vld [vmem:[#allocation21_spill] sm:$0xff]  ;;  %v4841_v5 = vld [vmem:[#allocation95_spill] sm:$0xff] }
 0x329   :  { %2459 = vmatpush3.bf16.msra.mxu0 %v4826_v29  ;;  %v4177_v9 = vadd.f32 %v1232_v14, %v935_v53  ;;  %v1233_v2 = vmul.f32 %v2421_v37, %v4827_v56  ;;  %v1585_v4 = vmul.f32 %v1232_v14, %v3374_v40  ;;  %v4839_v12 = vld [vmem:[#allocation25_spill] sm:$0xff]  ;;  %v4845_v14 = vld [vmem:[#allocation91_spill] sm:$0xff]  ;;  %v4846_v37 = vld [vmem:[#allocation22_spill] sm:$0xff]  ;;  %p2739_p12 = pnand %p2738_p11, %p2732_p8 }
 0x32a   :  { %2460 = vmatprep.subr.bf16.mxu0 %v1642_v22  ;;  %v4830_v22 = vld [vmem:[#allocation12_spill] sm:$0xff]  ;;  %v4840_v59 = vld [vmem:[#allocation93_spill] sm:$0xff]  ;;  %v4847_v29 = vld [vmem:[#allocation34_spill] sm:$0xff] }
 0x32b   :  { %v4181_v42 = vadd.f32 %v1233_v2, %v936_v24  ;;  %v1586_v35 = vmul.f32 %v1233_v2, %v4827_v56  ;;  %v4844_v53 = vld [vmem:[#allocation97_spill] sm:$0xff]  ;;  %v4849_v24 = vld [vmem:[#allocation96_spill] sm:$0xff]  ;;  %v4850_v2 = vld [vmem:[#allocation26_spill] sm:$0xff] }
 0x32d   :  { %2461 = vmatpush3.bf16.msra.mxu0 %v4829_v13  ;;  %v1594_v49 = vpack.c.bf16 %v1586_v35, %v1585_v4  ;;  %v4851_v4 = vld [vmem:[#allocation38_spill] sm:$0xff]  ;;  %v4854_v13 = vld [vmem:[#allocation31_spill] sm:$0xff] }
 0x32e   :  { %v4852_v35 = vld [vmem:[#allocation98_spill] sm:$0xff] }
 0x32f   :  { %2644 = vmatprep.subr.bf16.mxu1 %v1594_v49 }
 0x330   :  { %1676 = vmatmul.mubr.bf16.vlgmr.msra.gmra.mrb[64].mxu0 %v4830_v22  ;;  %2645 = vmatpush3.bf16.msra.mxu1 %v1594_v49  ;;  %v4855_v49 = vld [vmem:[#allocation41_spill] sm:$0xff]  ;;  %v4856_v22 = vld [vmem:[#allocation100_spill] sm:$0xff] }
 0x331   :  { %1683 = vmatprep.mubr.bf16.mxu0 %v4831_v45  ;;  %v4857_v45 = vld [vmem:[#allocation101_spill] sm:$0xff] }
 0x333   :  { %2647 = vmatmul.mubr.bf16.vlgmr.msra.gmra.mrb[64].mxu1 %v4832_v25  ;;  %v4858_v25 = vld [vmem:[#allocation35_spill] sm:$0xff] }
 0x334   :  { %2650 = vmatprep.mubr.bf16.mxu1 %v4833_v38  ;;  %v4859_v38 = vld [vmem:[#allocation102_spill] sm:$0xff] }
 0x338   :  { %1684 = vmatmul.mubr.bf16.gmra.mrb[68].mxu0 %v4834_v0 }
 0x339   :  { %1691 = vmatprep.mubr.bf16.mxu0 %v4835_v43 }
 0x33b   :  { %2651 = vmatmul.mubr.bf16.gmra.mrb[68].mxu1 %v4836_v17 }
 0x33c   :  { %2654 = vmatprep.mubr.bf16.mxu1 %v4837_v61 }
 0x340   :  { %1692 = vmatmul.mubr.bf16.gmra.mrb[72].mxu0 %v4838_v30  ;;  %v1427_v30 = vld [vmem:[#allocation5] sm:$0xff] }
 0x341   :  { %1699 = vmatprep.mubr.bf16.mxu0 %v4839_v12 }
 0x343   :  { %2655 = vmatmul.mubr.bf16.gmra.mrb[72].mxu1 %v4840_v59  ;;  %v4860_v59 = vld [vmem:[#allocation80_spill] sm:$0xff] }
 0x344   :  { %2658 = vmatprep.mubr.bf16.mxu1 %v4841_v5  ;;  %v1443_v5 = vadd.f32 %v1427_v30, %v4860_v59  ;;  %v4868_v59 = vld [vmem:[#allocation57_spill] sm:$0xff] }
 0x348   :  { %1700 = vmatmul.mubr.bf16.gmra.mrb[76].mxu0 %v4842_v3  ;;  %v4861_v3 = vld [vmem:[#allocation24_spill] sm:$0xff] }
 0x349   :  { %1707 = vmatprep.mubr.bf16.mxu0 %v4843_v32 }
 0x34b   :  { %2659 = vmatmul.mubr.bf16.gmra.mrb[76].mxu1 %v4844_v53 }
 0x34c   :  { %2662 = vmatprep.mubr.bf16.mxu1 %v4845_v14  ;;  %v1428_v14 = vld [vmem:[#allocation5 + $0x8] sm:$0xff] }
 0x350   :  { %1708 = vmatmul.mubr.bf16.gmra.mrb[80].mxu0 %v4846_v37 }
 0x351   :  { %1715 = vmatprep.mubr.bf16.mxu0 %v4847_v29  ;;  %v4862_v29 = vld [vmem:[#allocation11_spill] sm:$0xff] }
 0x353   :  { %2663 = vmatmul.mubr.bf16.gmra.mrb[80].mxu1 %v4848_v18  ;;  %v1444_v18 = vadd.f32 %v1428_v14, %v4862_v29  ;;  %v4870_v29 = vld [vmem:[#allocation64_spill] sm:$0xff] }
 0x354   :  { %2666 = vmatprep.mubr.bf16.mxu1 %v4849_v24 }
 0x358   :  { %1716 = vmatmul.mubr.bf16.gmra.mrb[84].mxu0 %v4850_v2  ;;  %v4863_v2 = vld [vmem:[#allocation23_spill] sm:$0xff] }
 0x359   :  { %1723 = vmatprep.mubr.bf16.mxu0 %v4851_v4 }
 0x35b   :  { %2667 = vmatmul.mubr.bf16.gmra.mrb[84].mxu1 %v4852_v35  ;;  %v4864_v35 = vld [vmem:[#allocation33_spill] sm:$0xff] }
 0x35c   :  { %2670 = vmatprep.mubr.bf16.mxu1 %v4853_v51 }
 0x360   :  { %1724 = vmatmul.mubr.bf16.gmra.mrb[88].mxu0 %v4854_v13 }
 0x361   :  { %1731 = vmatprep.mubr.bf16.mxu0 %v4855_v49  ;;  %v4865_v49 = vld [vmem:[#allocation16_spill] sm:$0xff] }
 0x363   :  { %2671 = vmatmul.mubr.bf16.gmra.mrb[88].mxu1 %v4856_v22 }
 0x364   :  { %2674 = vmatprep.mubr.bf16.mxu1 %v4857_v45 }
 0x368   :  { %1732 = vmatmul.mubr.bf16.gmra.mrb[92].mxu0 %v4858_v25 }
 0x36b   :  { %2675 = vmatmul.mubr.bf16.gmra.mrb[92].mxu1 %v4859_v38 }
 0x403   :  { %v2462_v0 = vpop.f32.mrb[64].mxu0 }
 0x404   :  { %v2463_v43 = vpop.f32.mrb[65].mxu0 }
 0x405   :  { %v2464_v17 = vadd.f32 %v2463_v43, %v2462_v0  ;;  %v2465_v61 = vpop.f32.mrb[66].mxu0  ;;  %v4866_v0 = vld [vmem:[#allocation65_spill] sm:$0xff] }
 0x406   :  { %v2466_v12 = vpop.f32.mrb[67].mxu0  ;;  %v2648_v37 = vpop.f32.mrb[64].mxu1 }
 0x407   :  { %v1740_v32 = vmul.f32 %v2464_v17, %v4861_v3  ;;  %v2467_v53 = vadd.f32 %v2466_v12, %v2465_v61  ;;  %v1919_v51 = vmul.f32 %v2648_v37, %v4864_v35  ;;  %v1790_v13 = vpop.f32.mrb[65].mxu1  ;;  %v4867_v17 = vld [vmem:[#allocation32_spill] sm:$0xff] }
 0x408   :  { %v1917_v22 = vmul.f32 %v1790_v13, %v4865_v49  ;;  %v2649_v45 = vpop.f32.mrb[66].mxu1 }
 0x409   :  { %v1965_v24 = vadd.f32 %v1740_v32, %v1443_v5  ;;  %v1741_v4 = vmul.f32 %v2467_v53, %v4863_v2  ;;  %v2031_v43 = vadd.f32 %v1919_v51, %v4866_v0  ;;  %v1920_v61 = vmul.f32 %v2649_v45, %v4867_v17  ;;  %v1793_v12 = vpop.f32.mrb[67].mxu1  ;;  %v4869_v5 = vld [vmem:[#allocation20_spill] sm:$0xff]  ;;  %v4873_v17 = vld [vmem:[#allocation37_spill] sm:$0xff] }
 0x40a   :  { %v2029_v3 = vadd.f32 %v1917_v22, %v4868_v59  ;;  %v1918_v32 = vmul.f32 %v1793_v12, %v4869_v5  ;;  %v4872_v0 = vld [vmem:[#allocation104_spill] sm:$0xff] }
 0x40b   :  { %v2109_v25 = vmul.f32 0.25, %v1965_v24  ;;  %v1966_v38 = vadd.f32 %v1741_v4, %v1444_v18  ;;  %v2468_v30 = vpop.f32.mrb[68].mxu0  ;;  %v2175_v37 = vmul.f32 0.25, %v2031_v43  ;;  %v2032_v2 = vadd.f32 %v1920_v61, %v4870_v29  ;;  %v1429_v24 = vld [vmem:[#allocation5 + $0x10] sm:$0xff]  ;;  %v4874_v61 = vld [vmem:[#allocation51_spill] sm:$0xff] }
 0x40c   :  { %v2469_v14 = vpop.f32.mrb[69].mxu0  ;;  %v2173_v18 = vmul.f32 0.25, %v2029_v3  ;;  %v4871_v4 = vld [vmem:[#allocation81_spill] sm:$0xff]  ;;  %v1445_v45 = vadd.f32 %v1429_v24, %v4872_v0  ;;  %v4875_v3 = vld [vmem:[#allocation36_spill] sm:$0xff] }
 0x40d   :  { %2125 = vst [vmem:[#allocation5] sm:$0xff] %v2109_v25  ;;  %v2110_v53 = vmul.f32 0.25, %v1966_v38  ;;  %v2470_v35 = vadd.f32 %v2469_v14, %v2468_v30  ;;  %v2471_v13 = vpop.f32.mrb[70].mxu0  ;;  %v2030_v51 = vadd.f32 %v1918_v32, %v4871_v4  ;;  %2207 = vst [vmem:[#allocation6 + $0x10] sm:$0xff] %v2175_v37  ;;  %v2176_v22 = vmul.f32 0.25, %v2032_v2  ;;  %v1430_v25 = vld [vmem:[#allocation5 + $0x18] sm:$0xff] }
 0x40e   :  { %v2472_v49 = vpop.f32.mrb[71].mxu0  ;;  %2205 = vst [vmem:[#allocation6] sm:$0xff] %v2173_v18  ;;  %v2652_v43 = vpop.f32.mrb[68].mxu1  ;;  %v1446_v30 = vadd.f32 %v1430_v25, %v4874_v61  ;;  %v4876_v32 = vld [vmem:[#allocation53_spill] sm:$0xff]  ;;  %v4880_v25 = vld [vmem:[#allocation72_spill] sm:$0xff] }
 0x40f   :  { %2126 = vst [vmem:[#allocation5 + $0x8] sm:$0xff] %v2110_v53  ;;  %v1742_v59 = vmul.f32 %v2470_v35, %v4873_v17  ;;  %v2473_v12 = vadd.f32 %v2472_v49, %v2471_v13  ;;  %v2174_v38 = vmul.f32 0.25, %v2030_v51  ;;  %2208 = vst [vmem:[#allocation6 + $0x18] sm:$0xff] %v2176_v22  ;;  %v1923_v29 = vmul.f32 %v2652_v43, %v4876_v32  ;;  %v1806_v4 = vpop.f32.mrb[69].mxu1  ;;  %v4877_v53 = vld [vmem:[#allocation45_spill] sm:$0xff]  ;;  %v4879_v51 = vld [vmem:[#allocation52_spill] sm:$0xff] }
 0x410   :  { %v1921_v37 = vmul.f32 %v1806_v4, %v4877_v53  ;;  %v2653_v2 = vpop.f32.mrb[70].mxu1  ;;  %v4878_v13 = vld [vmem:[#allocation73_spill] sm:$0xff] }
 0x411   :  { %v1967_v14 = vadd.f32 %v1742_v59, %v1445_v45  ;;  %v1743_v5 = vmul.f32 %v2473_v12, %v4875_v3  ;;  %2206 = vst [vmem:[#allocation6 + $0x8] sm:$0xff] %v2174_v38  ;;  %v2035_v49 = vadd.f32 %v1923_v29, %v4878_v13  ;;  %v1924_v0 = vmul.f32 %v2653_v2, %v4879_v51  ;;  %v1809_v17 = vpop.f32.mrb[71].mxu1  ;;  %v4881_v59 = vld [vmem:[#allocation44_spill] sm:$0xff]  ;;  %v4882_v38 = vld [vmem:[#allocation87_spill] sm:$0xff]  ;;  %v4884_v13 = vld [vmem:[#allocation106_spill] sm:$0xff] }
 0x412   :  { %v2033_v22 = vadd.f32 %v1921_v37, %v4880_v25  ;;  %v1922_v12 = vmul.f32 %v1809_v17, %v4881_v59  ;;  %v4885_v51 = vld [vmem:[#allocation47_spill] sm:$0xff] }
 0x413   :  { %v2111_v24 = vmul.f32 0.25, %v1967_v14  ;;  %v1968_v35 = vadd.f32 %v1743_v5, %v1446_v30  ;;  %v2474_v18 = vpop.f32.mrb[72].mxu0  ;;  %v2179_v61 = vmul.f32 0.25, %v2035_v49  ;;  %v2036_v3 = vadd.f32 %v1924_v0, %v4882_v38  ;;  %v1431_v14 = vld [vmem:[#allocation5 + $0x20] sm:$0xff]  ;;  %v4883_v5 = vld [vmem:[#allocation30_spill] sm:$0xff] }
 0x414   :  { %v2475_v45 = vpop.f32.mrb[73].mxu0  ;;  %v2177_v30 = vmul.f32 0.25, %v2033_v22  ;;  %v2034_v29 = vadd.f32 %v1922_v12, %v4883_v5  ;;  %v1447_v2 = vadd.f32 %v1431_v14, %v4884_v13  ;;  %v4886_v0 = vld [vmem:[#allocation107_spill] sm:$0xff]  ;;  %v4887_v22 = vld [vmem:[#allocation46_spill] sm:$0xff]  ;;  %v4888_v12 = vld [vmem:[#allocation69_spill] sm:$0xff] }
 0x415   :  { %2127 = vst [vmem:[#allocation5 + $0x10] sm:$0xff] %v2111_v24  ;;  %v2112_v43 = vmul.f32 0.25, %v1968_v35  ;;  %v2476_v32 = vadd.f32 %v2475_v45, %v2474_v18  ;;  %v2477_v4 = vpop.f32.mrb[74].mxu0  ;;  %2211 = vst [vmem:[#allocation6 + $0x30] sm:$0xff] %v2179_v61  ;;  %v2180_v37 = vmul.f32 0.25, %v2036_v3  ;;  %v1432_v24 = vld [vmem:[#allocation5 + $0x28] sm:$0xff] }
 0x416   :  { %v2478_v53 = vpop.f32.mrb[75].mxu0  ;;  %2209 = vst [vmem:[#allocation6 + $0x20] sm:$0xff] %v2177_v30  ;;  %v2178_v35 = vmul.f32 0.25, %v2034_v29  ;;  %v2656_v49 = vpop.f32.mrb[72].mxu1  ;;  %v1448_v18 = vadd.f32 %v1432_v24, %v4886_v0  ;;  %v4891_v29 = vld [vmem:[#allocation68_spill] sm:$0xff]  ;;  %v4892_v24 = vld [vmem:[#allocation50_spill] sm:$0xff] }
 0x417   :  { %2128 = vst [vmem:[#allocation5 + $0x18] sm:$0xff] %v2112_v43  ;;  %v1744_v25 = vmul.f32 %v2476_v32, %v4885_v51  ;;  %v2479_v17 = vadd.f32 %v2478_v53, %v2477_v4  ;;  %2212 = vst [vmem:[#allocation6 + $0x38] sm:$0xff] %v2180_v37  ;;  %v1927_v38 = vmul.f32 %v2656_v49, %v4888_v12  ;;  %v1822_v5 = vpop.f32.mrb[73].mxu1  ;;  %v4889_v43 = vld [vmem:[#allocation61_spill] sm:$0xff]  ;;  %v4890_v4 = vld [vmem:[#allocation103_spill] sm:$0xff] }
 0x418   :  { %2210 = vst [vmem:[#allocation6 + $0x28] sm:$0xff] %v2178_v35  ;;  %v1925_v61 = vmul.f32 %v1822_v5, %v4889_v43  ;;  %v2657_v3 = vpop.f32.mrb[74].mxu1  ;;  %v4894_v35 = vld [vmem:[#allocation42_spill] sm:$0xff] }
 0x419   :  { %v1969_v45 = vadd.f32 %v1744_v25, %v1447_v2  ;;  %v1745_v59 = vmul.f32 %v2479_v17, %v4887_v22  ;;  %v2039_v53 = vadd.f32 %v1927_v38, %v4890_v4  ;;  %v1928_v13 = vmul.f32 %v2657_v3, %v4891_v29  ;;  %v1825_v51 = vpop.f32.mrb[75].mxu1  ;;  %v4893_v25 = vld [vmem:[#allocation60_spill] sm:$0xff] }
 0x41a   :  { %v2037_v37 = vadd.f32 %v1925_v61, %v4892_v24  ;;  %v1926_v17 = vmul.f32 %v1825_v51, %v4893_v25 }
 0x41b   :  { %v2113_v14 = vmul.f32 0.25, %v1969_v45  ;;  %v1970_v32 = vadd.f32 %v1745_v59, %v1448_v18  ;;  %v2480_v30 = vpop.f32.mrb[76].mxu0  ;;  %v2183_v0 = vmul.f32 0.25, %v2039_v53  ;;  %v2040_v22 = vadd.f32 %v1928_v13, %v4894_v35  ;;  %v4895_v18 = vld [vmem:[#allocation105_spill] sm:$0xff]  ;;  %v4897_v53 = vld [vmem:[#allocation54_spill] sm:$0xff] }
 0x41c   :  { %v2481_v2 = vpop.f32.mrb[77].mxu0  ;;  %v2181_v45 = vmul.f32 0.25, %v2037_v37  ;;  %v2038_v59 = vadd.f32 %v1926_v17, %v4895_v18  ;;  %v4899_v37 = vld [vmem:[#allocation77_spill] sm:$0xff]  ;;  %v4903_v18 = vld [vmem:[#allocation66_spill] sm:$0xff] }
 0x41d   :  { %2129 = vst [vmem:[#allocation5 + $0x20] sm:$0xff] %v2113_v14  ;;  %v2114_v49 = vmul.f32 0.25, %v1970_v32  ;;  %v2482_v12 = vadd.f32 %v2481_v2, %v2480_v30  ;;  %v2483_v5 = vpop.f32.mrb[78].mxu0  ;;  %2215 = vst [vmem:[#allocation6 + $0x50] sm:$0xff] %v2183_v0  ;;  %v2184_v43 = vmul.f32 0.25, %v2040_v22  ;;  %v4896_v14 = vld [vmem:[#allocation74_spill] sm:$0xff] }
 0x41e   :  { %v2484_v38 = vpop.f32.mrb[79].mxu0  ;;  %2213 = vst [vmem:[#allocation6 + $0x40] sm:$0xff] %v2181_v45  ;;  %v2182_v4 = vmul.f32 0.25, %v2038_v59  ;;  %v2660_v29 = vpop.f32.mrb[76].mxu1  ;;  %v4898_v30 = vld [vmem:[#allocation85_spill] sm:$0xff] }
 0x41f   :  { %2130 = vst [vmem:[#allocation5 + $0x28] sm:$0xff] %v2114_v49  ;;  %v1746_v3 = vmul.f32 %v2482_v12, %v4790_v57  ;;  %v2485_v61 = vadd.f32 %v2484_v38, %v2483_v5  ;;  %2216 = vst [vmem:[#allocation6 + $0x58] sm:$0xff] %v2184_v43  ;;  %v1931_v51 = vmul.f32 %v2660_v29, %v4898_v30  ;;  %v1838_v24 = vpop.f32.mrb[77].mxu1  ;;  %v4900_v49 = vld [vmem:[#allocation83_spill] sm:$0xff]  ;;  %v4902_v12 = vld [vmem:[#allocation84_spill] sm:$0xff] }
 0x420   :  { %2214 = vst [vmem:[#allocation6 + $0x48] sm:$0xff] %v2182_v4  ;;  %v1929_v2 = vmul.f32 %v1838_v24, %v4899_v37  ;;  %v2661_v25 = vpop.f32.mrb[78].mxu1  ;;  %v4901_v57 = vld [vmem:[#allocation43_spill] sm:$0xff]  ;;  %v4904_v43 = vld [vmem:[#allocation76_spill] sm:$0xff] }
 0x421   :  { %v1971_v32 = vadd.f32 %v1746_v3, %v4896_v14  ;;  %v1747_v13 = vmul.f32 %v2485_v61, %v4897_v53  ;;  %v2043_v35 = vadd.f32 %v1931_v51, %v4901_v57  ;;  %v1932_v5 = vmul.f32 %v2661_v25, %v4902_v12  ;;  %v1841_v45 = vpop.f32.mrb[79].mxu1  ;;  %v4905_v29 = vld [vmem:[#allocation67_spill] sm:$0xff] }
 0x422   :  { %v2041_v59 = vadd.f32 %v1929_v2, %v4903_v18  ;;  %v1930_v3 = vmul.f32 %v1841_v45, %v4904_v43 }
 0x423   :  { %v2115_v17 = vmul.f32 0.25, %v1971_v32  ;;  %v1972_v0 = vadd.f32 %v1747_v13, %v4900_v49  ;;  %v2486_v22 = vpop.f32.mrb[80].mxu0  ;;  %v2187_v4 = vmul.f32 0.25, %v2043_v35  ;;  %v2044_v14 = vadd.f32 %v1932_v5, %v4905_v29  ;;  %v4906_v13 = vld [vmem:[#allocation59_spill] sm:$0xff]  ;;  %v4907_v35 = vld [vmem:[#allocation28_spill] sm:$0xff] }
 0x424   :  { %v2487_v38 = vpop.f32.mrb[81].mxu0  ;;  %v2185_v30 = vmul.f32 0.25, %v2041_v59  ;;  %v2042_v24 = vadd.f32 %v1930_v3, %v4906_v13  ;;  %v4908_v5 = vld [vmem:[#allocation15_spill] sm:$0xff] }
 0x425   :  { %2131 = vst [vmem:[#allocation5 + $0x30] sm:$0xff] %v2115_v17  ;;  %v2116_v61 = vmul.f32 0.25, %v1972_v0  ;;  %v2488_v53 = vadd.f32 %v2487_v38, %v2486_v22  ;;  %v2489_v32 = vpop.f32.mrb[82].mxu0  ;;  %2219 = vst [vmem:[#allocation6 + $0x70] sm:$0xff] %v2187_v4  ;;  %v2188_v37 = vmul.f32 0.25, %v2044_v14  ;;  %v4911_v14 = vld [vmem:[#allocation82_spill] sm:$0xff] }
 0x426   :  { %v2490_v51 = vpop.f32.mrb[83].mxu0  ;;  %2217 = vst [vmem:[#allocation6 + $0x60] sm:$0xff] %v2185_v30  ;;  %v2186_v49 = vmul.f32 0.25, %v2042_v24  ;;  %v2664_v57 = vpop.f32.mrb[80].mxu1  ;;  %v4913_v24 = vld [vmem:[#allocation111_spill] sm:$0xff] }
 0x427   :  { %2132 = vst [vmem:[#allocation5 + $0x38] sm:$0xff] %v2116_v61  ;;  %v1748_v25 = vmul.f32 %v2488_v53, %v4804_v52  ;;  %v2491_v2 = vadd.f32 %v2490_v51, %v2489_v32  ;;  %2220 = vst [vmem:[#allocation6 + $0x78] sm:$0xff] %v2188_v37  ;;  %v1935_v22 = vmul.f32 %v2664_v57, %v4907_v35  ;;  %v1854_v12 = vpop.f32.mrb[81].mxu1  ;;  %v4909_v52 = vld [vmem:[#allocation108_spill] sm:$0xff]  ;;  %v4910_v61 = vld [vmem:[#allocation27_spill] sm:$0xff] }
 0x428   :  { %2218 = vst [vmem:[#allocation6 + $0x68] sm:$0xff] %v2186_v49  ;;  %v1933_v45 = vmul.f32 %v1854_v12, %v4908_v5  ;;  %v2665_v18 = vpop.f32.mrb[82].mxu1 }
 0x429   :  { %v1973_v17 = vadd.f32 %v1748_v25, %v4043_v39  ;;  %v1749_v0 = vmul.f32 %v2491_v2, %v4809_v16  ;;  %v2047_v43 = vadd.f32 %v1935_v22, %v4909_v52  ;;  %v1936_v4 = vmul.f32 %v2665_v18, %v4910_v61  ;;  %v1857_v29 = vpop.f32.mrb[83].mxu1  ;;  %v4912_v16 = vld [vmem:[#allocation19_spill] sm:$0xff] }
 0x42a   :  { %v2045_v39 = vadd.f32 %v1933_v45, %v4911_v14  ;;  %v1934_v32 = vmul.f32 %v1857_v29, %v4912_v16 }
 0x42b   :  { %v2117_v59 = vmul.f32 0.25, %v1973_v17  ;;  %v1974_v38 = vadd.f32 %v1749_v0, %v4057_v10  ;;  %v2492_v3 = vpop.f32.mrb[84].mxu0  ;;  %v2191_v13 = vmul.f32 0.25, %v2047_v43  ;;  %v2048_v51 = vadd.f32 %v1936_v4, %v4913_v24  ;;  %v4914_v10 = vld [vmem:[#allocation112_spill] sm:$0xff] }
 0x42c   :  { %v2493_v53 = vpop.f32.mrb[85].mxu0  ;;  %v2189_v2 = vmul.f32 0.25, %v2045_v39  ;;  %v2046_v49 = vadd.f32 %v1934_v32, %v4914_v10 }
 0x42d   :  { %2133 = vst [vmem:[#allocation5 + $0x40] sm:$0xff] %v2117_v59  ;;  %v2118_v30 = vmul.f32 0.25, %v1974_v38  ;;  %v2494_v37 = vadd.f32 %v2493_v53, %v2492_v3  ;;  %v2495_v25 = vpop.f32.mrb[86].mxu0  ;;  %2223 = vst [vmem:[#allocation6 + $0x90] sm:$0xff] %v2191_v13  ;;  %v2192_v17 = vmul.f32 0.25, %v2048_v51  ;;  %v4915_v53 = vld [vmem:[#allocation113_spill] sm:$0xff] }
 0x42e   :  { %v2496_v57 = vpop.f32.mrb[87].mxu0  ;;  %2221 = vst [vmem:[#allocation6 + $0x80] sm:$0xff] %v2189_v2  ;;  %v2190_v22 = vmul.f32 0.25, %v2046_v49  ;;  %v2668_v12 = vpop.f32.mrb[84].mxu1 }
 0x42f   :  { %2134 = vst [vmem:[#allocation5 + $0x48] sm:$0xff] %v2118_v30  ;;  %v1750_v0 = vmul.f32 %v2494_v37, %v4813_v58  ;;  %v2497_v35 = vadd.f32 %v2496_v57, %v2495_v25  ;;  %2224 = vst [vmem:[#allocation6 + $0x98] sm:$0xff] %v2192_v17  ;;  %v1939_v18 = vmul.f32 %v2668_v12, %v4673_v46  ;;  %v1870_v59 = vpop.f32.mrb[85].mxu1 }
 0x430   :  { %2222 = vst [vmem:[#allocation6 + $0x88] sm:$0xff] %v2190_v22  ;;  %v1937_v38 = vmul.f32 %v1870_v59, %v4800_v47  ;;  %v2669_v52 = vpop.f32.mrb[86].mxu1 }
 0x431   :  { %v1975_v5 = vadd.f32 %v1750_v0, %v4097_v11  ;;  %v1751_v45 = vmul.f32 %v2497_v35, %v4817_v62  ;;  %v2051_v58 = vadd.f32 %v1939_v18, %v4025_v19  ;;  %v1940_v4 = vmul.f32 %v2669_v52, %v4803_v34  ;;  %v1873_v29 = vpop.f32.mrb[87].mxu1 }
 0x432   :  { %v2049_v11 = vadd.f32 %v1937_v38, %v4030_v55  ;;  %v1938_v62 = vmul.f32 %v1873_v29, %v4807_v48 }
 0x433   :  { %v2119_v43 = vmul.f32 0.25, %v1975_v5  ;;  %v1976_v3 = vadd.f32 %v1751_v45, %v4111_v21  ;;  %v2498_v61 = vpop.f32.mrb[88].mxu0  ;;  %v2195_v39 = vmul.f32 0.25, %v2051_v58  ;;  %v2052_v47 = vadd.f32 %v1940_v4, %v4915_v53  ;;  %v4916_v21 = vld [vmem:[#allocation75_spill] sm:$0xff] }
 0x434   :  { %v2499_v14 = vpop.f32.mrb[89].mxu0  ;;  %v2193_v30 = vmul.f32 0.25, %v2049_v11  ;;  %v2050_v13 = vadd.f32 %v1938_v62, %v4916_v21 }
 0x435   :  { %2135 = vst [vmem:[#allocation5 + $0x50] sm:$0xff] %v2119_v43  ;;  %v2120_v46 = vmul.f32 0.25, %v1976_v3  ;;  %v2500_v16 = vadd.f32 %v2499_v14, %v2498_v61  ;;  %v2501_v32 = vpop.f32.mrb[90].mxu0  ;;  %2227 = vst [vmem:[#allocation6 + $0xb0] sm:$0xff] %v2195_v39  ;;  %v2196_v34 = vmul.f32 0.25, %v2052_v47 }
 0x436   :  { %v2502_v19 = vpop.f32.mrb[91].mxu0  ;;  %2225 = vst [vmem:[#allocation6 + $0xa0] sm:$0xff] %v2193_v30  ;;  %v2194_v51 = vmul.f32 0.25, %v2050_v13  ;;  %v2672_v48 = vpop.f32.mrb[88].mxu1 }
 0x437   :  { %2136 = vst [vmem:[#allocation5 + $0x58] sm:$0xff] %v2120_v46  ;;  %v1752_v24 = vmul.f32 %v2500_v16, %v4821_v31  ;;  %v2503_v55 = vadd.f32 %v2502_v19, %v2501_v32  ;;  %2228 = vst [vmem:[#allocation6 + $0xb8] sm:$0xff] %v2196_v34  ;;  %v1943_v2 = vmul.f32 %v2672_v48, %v4685_v63  ;;  %v1886_v10 = vpop.f32.mrb[89].mxu1 }
 0x438   :  { %2226 = vst [vmem:[#allocation6 + $0xa8] sm:$0xff] %v2194_v51  ;;  %v1941_v49 = vmul.f32 %v1886_v10, %v4686_v23  ;;  %v2673_v57 = vpop.f32.mrb[90].mxu1 }
 0x439   :  { %v1977_v37 = vadd.f32 %v1752_v24, %v4151_v7  ;;  %v1753_v25 = vmul.f32 %v2503_v55, %v4824_v33  ;;  %v2055_v31 = vadd.f32 %v1943_v2, %v4079_v15  ;;  %v1944_v22 = vmul.f32 %v2673_v57, %v4687_v27  ;;  %v1889_v12 = vpop.f32.mrb[91].mxu1 }
 0x43a   :  { %v2053_v7 = vadd.f32 %v1941_v49, %v4084_v60  ;;  %v1942_v33 = vmul.f32 %v1889_v12, %v4815_v36 }
 0x43b   :  { %v2121_v17 = vmul.f32 0.25, %v1977_v37  ;;  %v1978_v0 = vadd.f32 %v1753_v25, %v4159_v50  ;;  %v2504_v35 = vpop.f32.mrb[92].mxu0  ;;  %v2199_v45 = vmul.f32 0.25, %v2055_v31  ;;  %v2056_v23 = vadd.f32 %v1944_v22, %v4089_v41  ;;  %v4917_v50 = vld [vmem:[#allocation114_spill] sm:$0xff] }
 0x43c   :  { %v2505_v5 = vpop.f32.mrb[93].mxu0  ;;  %v2197_v38 = vmul.f32 0.25, %v2053_v7  ;;  %v2054_v52 = vadd.f32 %v1942_v33, %v4917_v50 }
 0x43d   :  { %2137 = vst [vmem:[#allocation5 + $0x60] sm:$0xff] %v2121_v17  ;;  %v2122_v63 = vmul.f32 0.25, %v1978_v0  ;;  %v2506_v18 = vadd.f32 %v2505_v5, %v2504_v35  ;;  %v2507_v59 = vpop.f32.mrb[94].mxu0  ;;  %2231 = vst [vmem:[#allocation6 + $0xd0] sm:$0xff] %v2199_v45  ;;  %v2200_v27 = vmul.f32 0.25, %v2056_v23 }
 0x43e   :  { %v2508_v15 = vpop.f32.mrb[95].mxu0  ;;  %2229 = vst [vmem:[#allocation6 + $0xc0] sm:$0xff] %v2197_v38  ;;  %v2198_v3 = vmul.f32 0.25, %v2054_v52  ;;  %v2676_v36 = vpop.f32.mrb[92].mxu1 }
 0x43f   :  { %2138 = vst [vmem:[#allocation5 + $0x68] sm:$0xff] %v2122_v63  ;;  %v1754_v43 = vmul.f32 %v2506_v18, %v3374_v40  ;;  %v2509_v60 = vadd.f32 %v2508_v15, %v2507_v59  ;;  %2232 = vst [vmem:[#allocation6 + $0xd8] sm:$0xff] %v2200_v27  ;;  %v1947_v61 = vmul.f32 %v2676_v36, %v4691_v28  ;;  %v1902_v4 = vpop.f32.mrb[93].mxu1 }
 0x440   :  { %2230 = vst [vmem:[#allocation6 + $0xc8] sm:$0xff] %v2198_v3  ;;  %v1945_v29 = vmul.f32 %v1902_v4, %v4692_v44  ;;  %v2677_v11 = vpop.f32.mrb[94].mxu1 }
 0x441   :  { %v1979_v58 = vadd.f32 %v1754_v43, %v4177_v9  ;;  %v1755_v41 = vmul.f32 %v2509_v60, %v4827_v56  ;;  %v2059_v62 = vadd.f32 %v1947_v61, %v4133_v1  ;;  %v1948_v46 = vmul.f32 %v2677_v11, %v4693_v26  ;;  %v1905_v39 = vpop.f32.mrb[95].mxu1 }
 0x442   :  { %v2057_v9 = vadd.f32 %v1945_v29, %v4138_v8  ;;  %v1946_v56 = vmul.f32 %v1905_v39, %v4695_v6 }
 0x443   :  { %v2123_v14 = vmul.f32 0.25, %v1979_v58  ;;  %v1980_v40 = vadd.f32 %v1755_v41, %v4181_v42  ;;  %v2203_v44 = vmul.f32 0.25, %v2059_v62  ;;  %v2060_v53 = vadd.f32 %v1948_v46, %v4143_v54 }
 0x444   :  { %v2201_v47 = vmul.f32 0.25, %v2057_v9  ;;  %v2058_v42 = vadd.f32 %v1946_v56, %v4155_v20 }
 0x445   :  { %2139 = vst [vmem:[#allocation5 + $0x70] sm:$0xff] %v2123_v14  ;;  %v2124_v28 = vmul.f32 0.25, %v1980_v40  ;;  %2235 = vst [vmem:[#allocation6 + $0xf0] sm:$0xff] %v2203_v44  ;;  %v2204_v1 = vmul.f32 0.25, %v2060_v53 }
 0x446   :  { %2233 = vst [vmem:[#allocation6 + $0xe0] sm:$0xff] %v2201_v47  ;;  %v2202_v26 = vmul.f32 0.25, %v2058_v42 }
 0x447   :  { %2140 = vst [vmem:[#allocation5 + $0x78] sm:$0xff] %v2124_v28 }
 0x448   :  { %2742 = shalt.err (!%p2739_p12)
}
 0x449   :  { %s2743_s28 = scalar_lea.hbm %s4349_s5, 2048 }
 0x44a   :  { %p2744_p13 = scmp.ne.s32.totalorder %s4349_s5, %s2743_s28  ;;  %p2747_p0 = scmp.lt.u32.totalorder %s2743_s28, %s4349_s5 }
 0x44c   :  { %p2749_p1 = pnand %p2747_p0, %p2744_p13 }
 0x44e   :  { %2752 = shalt.err (!%p2749_p1)
}
 0x44f   :  { %s2787_s7 = smov 128   ;;  %s2788_s8 = smov 8   ;;  %2236 = vst [vmem:[#allocation6 + $0xf8] sm:$0xff] %v2204_v1  ;;  %2234 = vst [vmem:[#allocation6 + $0xe8] sm:$0xff] %v2202_v26 }
 0x450   :  { %2248 = dma.vmem_to_hbm [thread:$0]  %s2243_s22, 2048, %s4349_s5, [#allocation4], %s2787_s7, %s2787_s7, %s2788_s8  }
 0x451   :  { %s2753_s11 = scalar_lea.vmem %s4313_s24, 4096  ;;  %p2758_p3 = scmp.lt.s32.totalorder %s4313_s24, %s4313_s24 }
 0x452   :  { %p2754_p2 = scmp.ne.s32.totalorder %s4313_s24, %s2753_s11  ;;  %p2759_p4 = scmp.lt.s32.totalorder %s2753_s11, %s2753_s11 }
 0x454   :  { %p2760_p5 = por %p2759_p4, %p2758_p3 }
 0x456   :  { %p2761_p6 = pnand %p2760_p5, %p2754_p2 }
 0x458   :  { %2764 = shalt.err (!%p2761_p6)
}
 0x459   :  { %s2765_s14 = scalar_lea.hbm %s4350_s6, 4096 }
 0x45a   :  { %p2766_p7 = scmp.ne.s32.totalorder %s4350_s6, %s2765_s14  ;;  %p2769_p8 = scmp.lt.u32.totalorder %s2765_s14, %s4350_s6 }
 0x45c   :  { %p2771_p9 = pnand %p2769_p8, %p2766_p7 }
 0x45e   :  { %2774 = shalt.err (!%p2771_p9)
}
 0x45f   :  { %2260 = dma.vmem_to_hbm [thread:$0]  %s4313_s24, 4096, %s4350_s6, [#allocation7], %s2787_s7, %s2787_s7, %s2788_s8  }
 0x460   :  { %2777 = dma.done.wait [#allocation4], 2048  }
 0x461   :  { %2778 = vsyncadd [#allocation4], 4294965248 }
 0x462   :  { %2779 = dma.done.wait [#allocation7], 4096  }
 0x463   :  { %2780 = vsyncadd [#allocation7], 4294963200 }
 0x464   :  { %2267 = vsyncpa [#allocation3], 1 }
 0x465   :  { %2268 = vsyncpa [#allocation4], 1 }
 0x466   :  { %2269 = vsyncpa [#allocation7], 1 }

</bundles_post_ra>
